<compile_context>
chip_gen: v5e
topology: v5e:2x2
jax: 0.10.0
libtpu: 0.0.40
codegen_flags: <defaults>
</compile_context>

<pallas_src>
import functools

import jax
import jax.numpy as jnp
from jax import lax
from jax.experimental import pallas as pl
from jax.experimental.pallas import tpu as pltpu


# ----------------------------- Pallas kernel -----------------------------

def _prelu_val(x, a):
    return jnp.where(x > 0, x, a * x)


def _mag_compute(x_ref, w0_ref, b0_ref, w1_ref, b1_ref,
                 wq_ref, wk_ref, wv_ref, cpw_ref, cpb_ref,
                 C, a0, a1, gamma):
    """One SeHGNN_mag branch on the current batch tile.  Returns [Bt, H]."""
    wq = wq_ref[...]            # [H8, H]
    wk = wk_ref[...]            # [H8, H]
    wv = wv_ref[...]            # [H,  H]

    dn = (((1,), (1,)), ((), ()))   # contract last dims (no in-kernel transpose)

    z, fq, fk, fv = [], [], [], []
    for c in range(C):
        # grouped Conv1d1x1 (groups=C) + PReLU, twice
        y = jnp.dot(x_ref[c], w0_ref[c], preferred_element_type=jnp.float32) + b0_ref[c]
        y = _prelu_val(y, a0)
        zc = jnp.dot(y, w1_ref[c], preferred_element_type=jnp.float32) + b1_ref[c]
        zc = _prelu_val(zc, a1)                                   # [Bt, H]
        z.append(zc)
        # Transformer q/k/v projections per group (x_t[b,h,c] == z[c][b,h])
        fq.append(lax.dot_general(zc, wq, dn, preferred_element_type=jnp.float32))  # [Bt, H8]
        fk.append(lax.dot_general(zc, wk, dn, preferred_element_type=jnp.float32))  # [Bt, H8]
        fv.append(lax.dot_general(zc, wv, dn, preferred_element_type=jnp.float32))  # [Bt, H]

    # s[b, c, d] = sum_o fq[c][b,o] * fk[d][b,o]   (torch bmm(f^T, g))
    s = [[jnp.sum(fq[c] * fk[d], axis=1, keepdims=True) for d in range(C)]
         for c in range(C)]                                        # each [Bt, 1]

    Bt = z[0].shape[0]
    N = cpw_ref.shape[-1]
    acc = jnp.zeros((Bt, N), jnp.float32)
    for j in range(C):
        # softmax over c (torch dim=1) of s[:, :, j]
        col = [s[k][j] for k in range(C)]
        m = col[0]
        for k in range(1, C):
            m = jnp.maximum(m, col[k])
        e = [jnp.exp(ck - m) for ck in col]
        denom = e[0]
        for k in range(1, C):
            denom = denom + e[k]
        inv = 1.0 / denom                                          # [Bt, 1]
        # o[:, :, j] = sum_k fv[k] * beta[:, k, j]
        oj = fv[0] * (e[0] * inv)
        for k in range(1, C):
            oj = oj + fv[k] * (e[k] * inv)
        outj = gamma * oj + z[j]                                   # [Bt, H]
        # concat_project fused: result += o[:, :, j] @ cp_W[j]
        acc = acc + jnp.dot(outj, cpw_ref[j], preferred_element_type=jnp.float32)
    return acc + cpb_ref[...]


def _sehgnn_mix_kernel(
        # model_b (mag branch over 'b*' features)
        xb_ref, bW0, bB0, bW1, bB1, bWq, bWk, bWv, bCpw, bCpb,
        # model_f (mag branch over 'f*' features)
        xf_ref, fW0, fB0, fW1, fB1, fWq, fWk, fWv, fCpw, fCpb,
        # head: project_i + lr_output
        xi_ref, piW0, piB0, piW1, piB1, lrW0, lrB0, lrW1, lrB1,
        # output
        o_ref,
        *, C_b, C_f,
        b_a0, b_a1, b_gamma, f_a0, f_a1, f_gamma,
        pi_a0, pi_a1, mix_a, lr_a0, lr_a1):
    # project_i: Linear -> PReLU -> Linear -> PReLU (dropouts are identities)
    xi = jnp.dot(xi_ref[...], piW0[...], preferred_element_type=jnp.float32) + piB0[...]
    xi = _prelu_val(xi, pi_a0)
    xi = jnp.dot(xi, piW1[...], preferred_element_type=jnp.float32) + piB1[...]
    xi = _prelu_val(xi, pi_a1)

    # two SeHGNN_mag branches, fully in VMEM
    xb = _mag_compute(xb_ref, bW0, bB0, bW1, bB1, bWq, bWk, bWv, bCpw, bCpb,
                      C_b, b_a0, b_a1, b_gamma)
    xf = _mag_compute(xf_ref, fW0, fB0, fW1, fB1, fWq, fWk, fWv, fCpw, fCpb,
                      C_f, f_a0, f_a1, f_gamma)

    # mix PReLU + lr_output[0]: concat([xi,xb,xf]) @ W0 done as block-row sum
    h0 = (jnp.dot(_prelu_val(xi, mix_a), lrW0[0], preferred_element_type=jnp.float32)
          + jnp.dot(_prelu_val(xb, mix_a), lrW0[1], preferred_element_type=jnp.float32)
          + jnp.dot(_prelu_val(xf, mix_a), lrW0[2], preferred_element_type=jnp.float32)
          + lrB0[...])
    h0 = _prelu_val(h0, lr_a0)
    out = jnp.dot(h0, lrW1[...], preferred_element_type=jnp.float32) + lrB1[...]
    o_ref[...] = _prelu_val(out, lr_a1)
    # TODO(synk): Dropout layers are inference-mode identities (no in-kernel RNG dropout).


# ----------------------------- model forward -----------------------------

def sehgnn_mix_forward(feats_dict, p, *, batch_tile=128):
    keys_b = sorted(k for k in feats_dict if k[0] == 'b')
    keys_f = sorted(k for k in feats_dict if k[0] == 'f')
    # Stack directly in [C, B, F] layout (no activation transposes anywhere).
    x_b = jnp.stack([feats_dict[k] for k in keys_b], axis=0)
    x_f = jnp.stack([feats_dict[k] for k in keys_f], axis=0)
    xi = feats_dict['i']

    pb, pf = p['model_b'], p['model_f']
    C_b, B, M = x_b.shape
    C_f = x_f.shape[0]
    Fi = xi.shape[1]
    H = pb['cp_b'].shape[-1]

    # batch tiling (single step at small B; 'parallel' axis for megacore/v7x)
    tb = B if B <= batch_tile else batch_tile
    nb = pl.cdiv(B, tb)

    kern = functools.partial(
        _sehgnn_mix_kernel,
        C_b=C_b, C_f=C_f,
        b_a0=pb['fp_a0'], b_a1=pb['fp_a1'], b_gamma=pb['gamma'],
        f_a0=pf['fp_a0'], f_a1=pf['fp_a1'], f_gamma=pf['gamma'],
        pi_a0=p['pi_a0'], pi_a1=p['pi_a1'], mix_a=p['mix_a'],
        lr_a0=p['lr_a0'], lr_a1=p['lr_a1'])

    def wspec(arr):
        nd = arr.ndim
        return pl.BlockSpec(arr.shape, lambda i, _nd=nd: (0,) * _nd)

    operands = (
        x_b, pb['fp_W0'], pb['fp_b0'], pb['fp_W1'], pb['fp_b1'],
        pb['Wq'], pb['Wk'], pb['Wv'], pb['cp_W'], pb['cp_b'],
        x_f, pf['fp_W0'], pf['fp_b0'], pf['fp_W1'], pf['fp_b1'],
        pf['Wq'], pf['Wk'], pf['Wv'], pf['cp_W'], pf['cp_b'],
        xi, p['pi_W0t'], p['pi_b0'], p['pi_W1t'], p['pi_b1'],
        p['lr_W0_3'], p['lr_b0'], p['lr_W1t'], p['lr_b1'],
    )

    in_specs = [
        pl.BlockSpec((C_b, tb, M), lambda i: (0, i, 0)),
        wspec(pb['fp_W0']), wspec(pb['fp_b0']), wspec(pb['fp_W1']), wspec(pb['fp_b1']),
        wspec(pb['Wq']), wspec(pb['Wk']), wspec(pb['Wv']), wspec(pb['cp_W']), wspec(pb['cp_b']),
        pl.BlockSpec((C_f, tb, M), lambda i: (0, i, 0)),
        wspec(pf['fp_W0']), wspec(pf['fp_b0']), wspec(pf['fp_W1']), wspec(pf['fp_b1']),
        wspec(pf['Wq']), wspec(pf['Wk']), wspec(pf['Wv']), wspec(pf['cp_W']), wspec(pf['cp_b']),
        pl.BlockSpec((tb, Fi), lambda i: (i, 0)),
        wspec(p['pi_W0t']), wspec(p['pi_b0']), wspec(p['pi_W1t']), wspec(p['pi_b1']),
        wspec(p['lr_W0_3']), wspec(p['lr_b0']), wspec(p['lr_W1t']), wspec(p['lr_b1']),
    ]

    return pl.pallas_call(
        kern,
        out_shape=jax.ShapeDtypeStruct((B, H), jnp.float32),
        grid=(nb,),
        in_specs=in_specs,
        out_specs=pl.BlockSpec((tb, H), lambda i: (i, 0)),
        compiler_params=pltpu.CompilerParams(dimension_semantics=("parallel",)),
    )(*operands)


# ----------------------------- parameter init -----------------------------

def _xavier(key, shape, gain=1.4142135623730951):
    fan_in, fan_out = shape[-2], shape[-1]
    a = gain * (6.0 / (fan_in + fan_out)) ** 0.5
    return jax.random.uniform(key, shape, jnp.float32, -a, a)


def _spectral_normalize(W, key, n_iter=30):
    # approximates torch.nn.utils.spectral_norm's power iteration at setup time
    u = jax.random.normal(key, (W.shape[0],), dtype=jnp.float32)
    u = u / (jnp.linalg.norm(u) + 1e-12)
    v = W.T @ u
    for _ in range(n_iter):
        v = W.T @ u
        v = v / (jnp.linalg.norm(v) + 1e-12)
        u = W @ v
        u = u / (jnp.linalg.norm(u) + 1e-12)
    sigma = u @ (W @ v)
    return W / sigma


def init_mag_params(key, C, nfeat, hidden):
    ks = jax.random.split(key, 9)
    p = {}
    p['fp_W0'] = _xavier(ks[0], (C, nfeat, hidden))
    p['fp_b0'] = jnp.zeros((C, 1, hidden), jnp.float32)
    p['fp_a0'] = 0.25
    p['fp_W1'] = _xavier(ks[1], (C, hidden, hidden))
    p['fp_b1'] = jnp.zeros((C, 1, hidden), jnp.float32)
    p['fp_a1'] = 0.25
    p['Wq'] = _spectral_normalize(0.2 * jax.random.normal(ks[2], (hidden // 8, hidden), jnp.float32), ks[5])
    p['Wk'] = _spectral_normalize(0.2 * jax.random.normal(ks[3], (hidden // 8, hidden), jnp.float32), ks[6])
    p['Wv'] = _spectral_normalize(0.2 * jax.random.normal(ks[4], (hidden, hidden), jnp.float32), ks[7])
    p['gamma'] = 0.5   # nonzero so the attention path is actually exercised
    # concat_project weight stored per-group: cp_W[c, h, n] == flat_W[h*C + c, n]
    p['cp_W'] = _xavier(ks[8], (C, hidden, hidden))
    p['cp_b'] = jnp.zeros((1, hidden), jnp.float32)
    return p


def init_mix_params(key, nfeat, hidden, C_b, C_f):
    ks = jax.random.split(key, 6)
    p = {}
    p['model_b'] = init_mag_params(ks[0], C_b, nfeat, hidden)
    p['model_f'] = init_mag_params(ks[1], C_f, nfeat, hidden)
    p['pi_W0t'] = _xavier(ks[2], (2 * nfeat, hidden))
    p['pi_b0'] = jnp.zeros((1, hidden), jnp.float32)
    p['pi_a0'] = 0.25
    p['pi_W1t'] = _xavier(ks[3], (hidden, hidden))
    p['pi_b1'] = jnp.zeros((1, hidden), jnp.float32)
    p['pi_a1'] = 0.25
    p['mix_a'] = 0.25
    # lr_output first weight stored as [3, H, H]; row block k matches concat slot k
    p['lr_W0_3'] = _xavier(ks[4], (3, hidden, hidden))
    p['lr_b0'] = jnp.zeros((1, hidden), jnp.float32)
    p['lr_a0'] = 0.25
    p['lr_W1t'] = _xavier(ks[5], (hidden, hidden))
    p['lr_b1'] = jnp.zeros((1, hidden), jnp.float32)
    p['lr_a1'] = 0.25
    return p


# ----------------------------- pure-JAX reference -----------------------------

def _prelu(x, a):
    return jnp.where(x > 0, x, a * x)


def _mag_ref(x_stack, p):
    # x_stack: [B, C, nfeat]
    x = jnp.einsum('bcm,cmn->bcn', x_stack, p['fp_W0']) + p['fp_b0'][:, 0, :]
    x = _prelu(x, p['fp_a0'])
    x = jnp.einsum('bcm,cmn->bcn', x, p['fp_W1']) + p['fp_b1'][:, 0, :]
    x = _prelu(x, p['fp_a1'])
    x = jnp.transpose(x, (0, 2, 1))                     # [B, H, C]
    f = jnp.einsum('oh,bhc->boc', p['Wq'], x)
    g = jnp.einsum('oh,bhc->boc', p['Wk'], x)
    h = jnp.einsum('oh,bhc->boc', p['Wv'], x)
    s = jnp.einsum('boc,bod->bcd', f, g)
    beta = jax.nn.softmax(s, axis=1)
    o = p['gamma'] * jnp.einsum('bhc,bcd->bhd', h, beta) + x
    B, H, C = x.shape
    cp_flat = jnp.transpose(p['cp_W'], (1, 0, 2)).reshape(C * H, H)
    return o.reshape(B, -1) @ cp_flat + p['cp_b']


def reference_forward(feats_dict, p):
    xi = _prelu(feats_dict['i'] @ p['pi_W0t'] + p['pi_b0'], p['pi_a0'])
    xi = _prelu(xi @ p['pi_W1t'] + p['pi_b1'], p['pi_a1'])
    keys_b = sorted(k for k in feats_dict if k[0] == 'b')
    keys_f = sorted(k for k in feats_dict if k[0] == 'f')
    xb = _mag_ref(jnp.stack([feats_dict[k] for k in keys_b], axis=1), p['model_b'])
    xf = _mag_ref(jnp.stack([feats_dict[k] for k in keys_f], axis=1), p['model_f'])
    x = jnp.concatenate([xi, xb, xf], axis=1)
    x = _prelu(x, p['mix_a'])
    H = xi.shape[1]
    lrW0 = p['lr_W0_3'].reshape(3 * H, H)
    x = _prelu(x @ lrW0 + p['lr_b0'], p['lr_a0'])
    x = _prelu(x @ p['lr_W1t'] + p['lr_b1'], p['lr_a1'])
    return x


# ----------------------------- main -----------------------------

if __name__ == "__main__":
    import numpy as np

    B, nfeat, hidden = 8, 16, 32
    feat_keys = ['b', 'b1', 'b2', 'f', 'f1']   # tgt keys 'b' and 'f' are present

    key = jax.random.PRNGKey(0)
    kp, kd = jax.random.split(key)
    params = init_mix_params(kp, nfeat, hidden, C_b=3, C_f=2)

    dks = jax.random.split(kd, len(feat_keys) + 1)
    feats = {k: jax.random.normal(dks[i], (B, nfeat), jnp.float32)
             for i, k in enumerate(feat_keys)}
    feats['i'] = jax.random.normal(dks[-1], (B, 2 * nfeat), jnp.float32)

    out = jax.block_until_ready(sehgnn_mix_forward(feats, params))
    ref = jax.block_until_ready(reference_forward(feats, params))
    assert out.shape == (B, hidden)
    np.testing.assert_allclose(np.asarray(out), np.asarray(ref), rtol=1e-2, atol=1e-2)
    print("KERNEL_OK")
</pallas_src>

<mosaic_0001>
module attributes {stable_mosaic.version = 11 : i64} {
  func.func @_sehgnn_mix_kernel(%arg0: i32, %arg1: memref<3x8x16xf32, #tpu.memory_space<vmem>>, %arg2: memref<3x16x32xf32, #tpu.memory_space<vmem>>, %arg3: memref<3x1x32xf32, #tpu.memory_space<vmem>>, %arg4: memref<3x32x32xf32, #tpu.memory_space<vmem>>, %arg5: memref<3x1x32xf32, #tpu.memory_space<vmem>>, %arg6: memref<4x32xf32, #tpu.memory_space<vmem>>, %arg7: memref<4x32xf32, #tpu.memory_space<vmem>>, %arg8: memref<32x32xf32, #tpu.memory_space<vmem>>, %arg9: memref<3x32x32xf32, #tpu.memory_space<vmem>>, %arg10: memref<1x32xf32, #tpu.memory_space<vmem>>, %arg11: memref<2x8x16xf32, #tpu.memory_space<vmem>>, %arg12: memref<2x16x32xf32, #tpu.memory_space<vmem>>, %arg13: memref<2x1x32xf32, #tpu.memory_space<vmem>>, %arg14: memref<2x32x32xf32, #tpu.memory_space<vmem>>, %arg15: memref<2x1x32xf32, #tpu.memory_space<vmem>>, %arg16: memref<4x32xf32, #tpu.memory_space<vmem>>, %arg17: memref<4x32xf32, #tpu.memory_space<vmem>>, %arg18: memref<32x32xf32, #tpu.memory_space<vmem>>, %arg19: memref<2x32x32xf32, #tpu.memory_space<vmem>>, %arg20: memref<1x32xf32, #tpu.memory_space<vmem>>, %arg21: memref<8x32xf32, #tpu.memory_space<vmem>>, %arg22: memref<32x32xf32, #tpu.memory_space<vmem>>, %arg23: memref<1x32xf32, #tpu.memory_space<vmem>>, %arg24: memref<32x32xf32, #tpu.memory_space<vmem>>, %arg25: memref<1x32xf32, #tpu.memory_space<vmem>>, %arg26: memref<3x32x32xf32, #tpu.memory_space<vmem>>, %arg27: memref<1x32xf32, #tpu.memory_space<vmem>>, %arg28: memref<32x32xf32, #tpu.memory_space<vmem>>, %arg29: memref<1x32xf32, #tpu.memory_space<vmem>>, %arg30: memref<8x32xf32, #tpu.memory_space<vmem>>) attributes {dimension_semantics = [#tpu.dimension_semantics<parallel>], iteration_bounds = array<i64: 1>, scalar_prefetch = 0 : i64, scratch_operands = 0 : i64, tpu.core_type = #tpu.core_type<tc>, window_params = [{transform_indices = @transform_0, window_bounds = array<i64: 3, 8, 16>}, {pipeline_mode = #tpu.pipeline_mode<synchronous>, transform_indices = @transform_1, window_bounds = array<i64: 3, 16, 32>}, {pipeline_mode = #tpu.pipeline_mode<synchronous>, transform_indices = @transform_2, window_bounds = array<i64: 3, 1, 32>}, {pipeline_mode = #tpu.pipeline_mode<synchronous>, transform_indices = @transform_3, window_bounds = array<i64: 3, 32, 32>}, {pipeline_mode = #tpu.pipeline_mode<synchronous>, transform_indices = @transform_4, window_bounds = array<i64: 3, 1, 32>}, {pipeline_mode = #tpu.pipeline_mode<synchronous>, transform_indices = @transform_5, window_bounds = array<i64: 4, 32>}, {pipeline_mode = #tpu.pipeline_mode<synchronous>, transform_indices = @transform_6, window_bounds = array<i64: 4, 32>}, {pipeline_mode = #tpu.pipeline_mode<synchronous>, transform_indices = @transform_7, window_bounds = array<i64: 32, 32>}, {pipeline_mode = #tpu.pipeline_mode<synchronous>, transform_indices = @transform_8, window_bounds = array<i64: 3, 32, 32>}, {pipeline_mode = #tpu.pipeline_mode<synchronous>, transform_indices = @transform_9, window_bounds = array<i64: 1, 32>}, {transform_indices = @transform_10, window_bounds = array<i64: 2, 8, 16>}, {pipeline_mode = #tpu.pipeline_mode<synchronous>, transform_indices = @transform_11, window_bounds = array<i64: 2, 16, 32>}, {pipeline_mode = #tpu.pipeline_mode<synchronous>, transform_indices = @transform_12, window_bounds = array<i64: 2, 1, 32>}, {pipeline_mode = #tpu.pipeline_mode<synchronous>, transform_indices = @transform_13, window_bounds = array<i64: 2, 32, 32>}, {pipeline_mode = #tpu.pipeline_mode<synchronous>, transform_indices = @transform_14, window_bounds = array<i64: 2, 1, 32>}, {pipeline_mode = #tpu.pipeline_mode<synchronous>, transform_indices = @transform_15, window_bounds = array<i64: 4, 32>}, {pipeline_mode = #tpu.pipeline_mode<synchronous>, transform_indices = @transform_16, window_bounds = array<i64: 4, 32>}, {pipeline_mode = #tpu.pipeline_mode<synchronous>, transform_indices = @transform_17, window_bounds = array<i64: 32, 32>}, {pipeline_mode = #tpu.pipeline_mode<synchronous>, transform_indices = @transform_18, window_bounds = array<i64: 2, 32, 32>}, {pipeline_mode = #tpu.pipeline_mode<synchronous>, transform_indices = @transform_19, window_bounds = array<i64: 1, 32>}, {transform_indices = @transform_20, window_bounds = array<i64: 8, 32>}, {pipeline_mode = #tpu.pipeline_mode<synchronous>, transform_indices = @transform_21, window_bounds = array<i64: 32, 32>}, {pipeline_mode = #tpu.pipeline_mode<synchronous>, transform_indices = @transform_22, window_bounds = array<i64: 1, 32>}, {pipeline_mode = #tpu.pipeline_mode<synchronous>, transform_indices = @transform_23, window_bounds = array<i64: 32, 32>}, {pipeline_mode = #tpu.pipeline_mode<synchronous>, transform_indices = @transform_24, window_bounds = array<i64: 1, 32>}, {pipeline_mode = #tpu.pipeline_mode<synchronous>, transform_indices = @transform_25, window_bounds = array<i64: 3, 32, 32>}, {pipeline_mode = #tpu.pipeline_mode<synchronous>, transform_indices = @transform_26, window_bounds = array<i64: 1, 32>}, {pipeline_mode = #tpu.pipeline_mode<synchronous>, transform_indices = @transform_27, window_bounds = array<i64: 32, 32>}, {pipeline_mode = #tpu.pipeline_mode<synchronous>, transform_indices = @transform_28, window_bounds = array<i64: 1, 32>}, {transform_indices = @transform_29, window_bounds = array<i64: 8, 32>}]} {
    %c0 = arith.constant 0 : index
    %c0_0 = arith.constant 0 : index
    %0 = vector.load %arg21[%c0, %c0_0] : memref<8x32xf32, #tpu.memory_space<vmem>>, vector<8x32xf32>
    %c0_1 = arith.constant 0 : index
    %c0_2 = arith.constant 0 : index
    %1 = vector.load %arg22[%c0_1, %c0_2] : memref<32x32xf32, #tpu.memory_space<vmem>>, vector<32x32xf32>
    %cst = arith.constant dense<0.000000e+00> : vector<8x32xf32>
    %2 = tpu.matmul %0, %1, %cst {dimension_numbers = #tpu.dot_dimension_numbers<[1], [0], [0], [1], [0, 0, 1, 1], [], []>} : vector<8x32xf32>, vector<32x32xf32>, vector<8x32xf32> -> vector<8x32xf32>
    %c0_3 = arith.constant 0 : index
    %c0_4 = arith.constant 0 : index
    %3 = vector.load %arg23[%c0_3, %c0_4] : memref<1x32xf32, #tpu.memory_space<vmem>>, vector<1x32xf32>
    %4 = vector.broadcast %3 : vector<1x32xf32> to vector<8x32xf32>
    %5 = arith.addf %2, %4 : vector<8x32xf32>
    %cst_5 = arith.constant 0.000000e+00 : f32
    %6 = vector.broadcast %cst_5 : f32 to vector<8x32xf32>
    %7 = arith.cmpf ogt, %5, %6 : vector<8x32xf32>
    %cst_6 = arith.constant 2.500000e-01 : f32
    %8 = vector.broadcast %cst_6 : f32 to vector<8x32xf32>
    %9 = arith.mulf %8, %5 : vector<8x32xf32>
    %10 = arith.select %7, %5, %9 : vector<8x32xi1>, vector<8x32xf32>
    %c0_7 = arith.constant 0 : index
    %c0_8 = arith.constant 0 : index
    %11 = vector.load %arg24[%c0_7, %c0_8] : memref<32x32xf32, #tpu.memory_space<vmem>>, vector<32x32xf32>
    %cst_9 = arith.constant dense<0.000000e+00> : vector<8x32xf32>
    %12 = tpu.matmul %10, %11, %cst_9 {dimension_numbers = #tpu.dot_dimension_numbers<[1], [0], [0], [1], [0, 0, 1, 1], [], []>} : vector<8x32xf32>, vector<32x32xf32>, vector<8x32xf32> -> vector<8x32xf32>
    %c0_10 = arith.constant 0 : index
    %c0_11 = arith.constant 0 : index
    %13 = vector.load %arg25[%c0_10, %c0_11] : memref<1x32xf32, #tpu.memory_space<vmem>>, vector<1x32xf32>
    %14 = vector.broadcast %13 : vector<1x32xf32> to vector<8x32xf32>
    %15 = arith.addf %12, %14 : vector<8x32xf32>
    %cst_12 = arith.constant 0.000000e+00 : f32
    %16 = vector.broadcast %cst_12 : f32 to vector<8x32xf32>
    %17 = arith.cmpf ogt, %15, %16 : vector<8x32xf32>
    %cst_13 = arith.constant 2.500000e-01 : f32
    %18 = vector.broadcast %cst_13 : f32 to vector<8x32xf32>
    %19 = arith.mulf %18, %15 : vector<8x32xf32>
    %20 = arith.select %17, %15, %19 : vector<8x32xi1>, vector<8x32xf32>
    %c0_14 = arith.constant 0 : index
    %c0_15 = arith.constant 0 : index
    %21 = vector.load %arg6[%c0_14, %c0_15] : memref<4x32xf32, #tpu.memory_space<vmem>>, vector<4x32xf32>
    %c0_16 = arith.constant 0 : index
    %c0_17 = arith.constant 0 : index
    %22 = vector.load %arg7[%c0_16, %c0_17] : memref<4x32xf32, #tpu.memory_space<vmem>>, vector<4x32xf32>
    %c0_18 = arith.constant 0 : index
    %c0_19 = arith.constant 0 : index
    %23 = vector.load %arg8[%c0_18, %c0_19] : memref<32x32xf32, #tpu.memory_space<vmem>>, vector<32x32xf32>
    %c0_20 = arith.constant 0 : index
    %c0_21 = arith.constant 0 : index
    %c0_22 = arith.constant 0 : index
    %24 = vector.load %arg1[%c0_20, %c0_21, %c0_22] : memref<3x8x16xf32, #tpu.memory_space<vmem>>, vector<1x8x16xf32>
    %25 = vector.shape_cast %24 : vector<1x8x16xf32> to vector<8x16xf32>
    %c0_23 = arith.constant 0 : index
    %c0_24 = arith.constant 0 : index
    %c0_25 = arith.constant 0 : index
    %26 = vector.load %arg2[%c0_23, %c0_24, %c0_25] : memref<3x16x32xf32, #tpu.memory_space<vmem>>, vector<1x16x32xf32>
    %27 = vector.shape_cast %26 : vector<1x16x32xf32> to vector<16x32xf32>
    %cst_26 = arith.constant dense<0.000000e+00> : vector<8x32xf32>
    %28 = tpu.matmul %25, %27, %cst_26 {dimension_numbers = #tpu.dot_dimension_numbers<[1], [0], [0], [1], [0, 0, 1, 1], [], []>} : vector<8x16xf32>, vector<16x32xf32>, vector<8x32xf32> -> vector<8x32xf32>
    %c0_27 = arith.constant 0 : index
    %c0_28 = arith.constant 0 : index
    %c0_29 = arith.constant 0 : index
    %29 = vector.load %arg3[%c0_27, %c0_28, %c0_29] : memref<3x1x32xf32, #tpu.memory_space<vmem>>, vector<1x1x32xf32>
    %30 = vector.shape_cast %29 : vector<1x1x32xf32> to vector<1x32xf32>
    %31 = vector.broadcast %30 : vector<1x32xf32> to vector<8x32xf32>
    %32 = arith.addf %28, %31 : vector<8x32xf32>
    %cst_30 = arith.constant 0.000000e+00 : f32
    %33 = vector.broadcast %cst_30 : f32 to vector<8x32xf32>
    %34 = arith.cmpf ogt, %32, %33 : vector<8x32xf32>
    %cst_31 = arith.constant 2.500000e-01 : f32
    %35 = vector.broadcast %cst_31 : f32 to vector<8x32xf32>
    %36 = arith.mulf %35, %32 : vector<8x32xf32>
    %37 = arith.select %34, %32, %36 : vector<8x32xi1>, vector<8x32xf32>
    %c0_32 = arith.constant 0 : index
    %c0_33 = arith.constant 0 : index
    %c0_34 = arith.constant 0 : index
    %38 = vector.load %arg4[%c0_32, %c0_33, %c0_34] : memref<3x32x32xf32, #tpu.memory_space<vmem>>, vector<1x32x32xf32>
    %39 = vector.shape_cast %38 : vector<1x32x32xf32> to vector<32x32xf32>
    %cst_35 = arith.constant dense<0.000000e+00> : vector<8x32xf32>
    %40 = tpu.matmul %37, %39, %cst_35 {dimension_numbers = #tpu.dot_dimension_numbers<[1], [0], [0], [1], [0, 0, 1, 1], [], []>} : vector<8x32xf32>, vector<32x32xf32>, vector<8x32xf32> -> vector<8x32xf32>
    %c0_36 = arith.constant 0 : index
    %c0_37 = arith.constant 0 : index
    %c0_38 = arith.constant 0 : index
    %41 = vector.load %arg5[%c0_36, %c0_37, %c0_38] : memref<3x1x32xf32, #tpu.memory_space<vmem>>, vector<1x1x32xf32>
    %42 = vector.shape_cast %41 : vector<1x1x32xf32> to vector<1x32xf32>
    %43 = vector.broadcast %42 : vector<1x32xf32> to vector<8x32xf32>
    %44 = arith.addf %40, %43 : vector<8x32xf32>
    %cst_39 = arith.constant 0.000000e+00 : f32
    %45 = vector.broadcast %cst_39 : f32 to vector<8x32xf32>
    %46 = arith.cmpf ogt, %44, %45 : vector<8x32xf32>
    %cst_40 = arith.constant 2.500000e-01 : f32
    %47 = vector.broadcast %cst_40 : f32 to vector<8x32xf32>
    %48 = arith.mulf %47, %44 : vector<8x32xf32>
    %49 = arith.select %46, %44, %48 : vector<8x32xi1>, vector<8x32xf32>
    %cst_41 = arith.constant dense<0.000000e+00> : vector<8x4xf32>
    %50 = tpu.matmul %49, %21, %cst_41 {dimension_numbers = #tpu.dot_dimension_numbers<[1], [1], [0], [0], [0, 0, 1, 0], [], []>} : vector<8x32xf32>, vector<4x32xf32>, vector<8x4xf32> -> vector<8x4xf32>
    %cst_42 = arith.constant dense<0.000000e+00> : vector<8x4xf32>
    %51 = tpu.matmul %49, %22, %cst_42 {dimension_numbers = #tpu.dot_dimension_numbers<[1], [1], [0], [0], [0, 0, 1, 0], [], []>} : vector<8x32xf32>, vector<4x32xf32>, vector<8x4xf32> -> vector<8x4xf32>
    %cst_43 = arith.constant dense<0.000000e+00> : vector<8x32xf32>
    %52 = tpu.matmul %49, %23, %cst_43 {dimension_numbers = #tpu.dot_dimension_numbers<[1], [1], [0], [0], [0, 0, 1, 0], [], []>} : vector<8x32xf32>, vector<32x32xf32>, vector<8x32xf32> -> vector<8x32xf32>
    %c1 = arith.constant 1 : index
    %c0_44 = arith.constant 0 : index
    %c0_45 = arith.constant 0 : index
    %53 = vector.load %arg1[%c1, %c0_44, %c0_45] : memref<3x8x16xf32, #tpu.memory_space<vmem>>, vector<1x8x16xf32>
    %54 = vector.shape_cast %53 : vector<1x8x16xf32> to vector<8x16xf32>
    %c1_46 = arith.constant 1 : index
    %c0_47 = arith.constant 0 : index
    %c0_48 = arith.constant 0 : index
    %55 = vector.load %arg2[%c1_46, %c0_47, %c0_48] : memref<3x16x32xf32, #tpu.memory_space<vmem>>, vector<1x16x32xf32>
    %56 = vector.shape_cast %55 : vector<1x16x32xf32> to vector<16x32xf32>
    %cst_49 = arith.constant dense<0.000000e+00> : vector<8x32xf32>
    %57 = tpu.matmul %54, %56, %cst_49 {dimension_numbers = #tpu.dot_dimension_numbers<[1], [0], [0], [1], [0, 0, 1, 1], [], []>} : vector<8x16xf32>, vector<16x32xf32>, vector<8x32xf32> -> vector<8x32xf32>
    %c1_50 = arith.constant 1 : index
    %c0_51 = arith.constant 0 : index
    %c0_52 = arith.constant 0 : index
    %58 = vector.load %arg3[%c1_50, %c0_51, %c0_52] : memref<3x1x32xf32, #tpu.memory_space<vmem>>, vector<1x1x32xf32>
    %59 = vector.shape_cast %58 : vector<1x1x32xf32> to vector<1x32xf32>
    %60 = vector.broadcast %59 : vector<1x32xf32> to vector<8x32xf32>
    %61 = arith.addf %57, %60 : vector<8x32xf32>
    %cst_53 = arith.constant 0.000000e+00 : f32
    %62 = vector.broadcast %cst_53 : f32 to vector<8x32xf32>
    %63 = arith.cmpf ogt, %61, %62 : vector<8x32xf32>
    %cst_54 = arith.constant 2.500000e-01 : f32
    %64 = vector.broadcast %cst_54 : f32 to vector<8x32xf32>
    %65 = arith.mulf %64, %61 : vector<8x32xf32>
    %66 = arith.select %63, %61, %65 : vector<8x32xi1>, vector<8x32xf32>
    %c1_55 = arith.constant 1 : index
    %c0_56 = arith.constant 0 : index
    %c0_57 = arith.constant 0 : index
    %67 = vector.load %arg4[%c1_55, %c0_56, %c0_57] : memref<3x32x32xf32, #tpu.memory_space<vmem>>, vector<1x32x32xf32>
    %68 = vector.shape_cast %67 : vector<1x32x32xf32> to vector<32x32xf32>
    %cst_58 = arith.constant dense<0.000000e+00> : vector<8x32xf32>
    %69 = tpu.matmul %66, %68, %cst_58 {dimension_numbers = #tpu.dot_dimension_numbers<[1], [0], [0], [1], [0, 0, 1, 1], [], []>} : vector<8x32xf32>, vector<32x32xf32>, vector<8x32xf32> -> vector<8x32xf32>
    %c1_59 = arith.constant 1 : index
    %c0_60 = arith.constant 0 : index
    %c0_61 = arith.constant 0 : index
    %70 = vector.load %arg5[%c1_59, %c0_60, %c0_61] : memref<3x1x32xf32, #tpu.memory_space<vmem>>, vector<1x1x32xf32>
    %71 = vector.shape_cast %70 : vector<1x1x32xf32> to vector<1x32xf32>
    %72 = vector.broadcast %71 : vector<1x32xf32> to vector<8x32xf32>
    %73 = arith.addf %69, %72 : vector<8x32xf32>
    %cst_62 = arith.constant 0.000000e+00 : f32
    %74 = vector.broadcast %cst_62 : f32 to vector<8x32xf32>
    %75 = arith.cmpf ogt, %73, %74 : vector<8x32xf32>
    %cst_63 = arith.constant 2.500000e-01 : f32
    %76 = vector.broadcast %cst_63 : f32 to vector<8x32xf32>
    %77 = arith.mulf %76, %73 : vector<8x32xf32>
    %78 = arith.select %75, %73, %77 : vector<8x32xi1>, vector<8x32xf32>
    %cst_64 = arith.constant dense<0.000000e+00> : vector<8x4xf32>
    %79 = tpu.matmul %78, %21, %cst_64 {dimension_numbers = #tpu.dot_dimension_numbers<[1], [1], [0], [0], [0, 0, 1, 0], [], []>} : vector<8x32xf32>, vector<4x32xf32>, vector<8x4xf32> -> vector<8x4xf32>
    %cst_65 = arith.constant dense<0.000000e+00> : vector<8x4xf32>
    %80 = tpu.matmul %78, %22, %cst_65 {dimension_numbers = #tpu.dot_dimension_numbers<[1], [1], [0], [0], [0, 0, 1, 0], [], []>} : vector<8x32xf32>, vector<4x32xf32>, vector<8x4xf32> -> vector<8x4xf32>
    %cst_66 = arith.constant dense<0.000000e+00> : vector<8x32xf32>
    %81 = tpu.matmul %78, %23, %cst_66 {dimension_numbers = #tpu.dot_dimension_numbers<[1], [1], [0], [0], [0, 0, 1, 0], [], []>} : vector<8x32xf32>, vector<32x32xf32>, vector<8x32xf32> -> vector<8x32xf32>
    %c2 = arith.constant 2 : index
    %c0_67 = arith.constant 0 : index
    %c0_68 = arith.constant 0 : index
    %82 = vector.load %arg1[%c2, %c0_67, %c0_68] : memref<3x8x16xf32, #tpu.memory_space<vmem>>, vector<1x8x16xf32>
    %83 = vector.shape_cast %82 : vector<1x8x16xf32> to vector<8x16xf32>
    %c2_69 = arith.constant 2 : index
    %c0_70 = arith.constant 0 : index
    %c0_71 = arith.constant 0 : index
    %84 = vector.load %arg2[%c2_69, %c0_70, %c0_71] : memref<3x16x32xf32, #tpu.memory_space<vmem>>, vector<1x16x32xf32>
    %85 = vector.shape_cast %84 : vector<1x16x32xf32> to vector<16x32xf32>
    %cst_72 = arith.constant dense<0.000000e+00> : vector<8x32xf32>
    %86 = tpu.matmul %83, %85, %cst_72 {dimension_numbers = #tpu.dot_dimension_numbers<[1], [0], [0], [1], [0, 0, 1, 1], [], []>} : vector<8x16xf32>, vector<16x32xf32>, vector<8x32xf32> -> vector<8x32xf32>
    %c2_73 = arith.constant 2 : index
    %c0_74 = arith.constant 0 : index
    %c0_75 = arith.constant 0 : index
    %87 = vector.load %arg3[%c2_73, %c0_74, %c0_75] : memref<3x1x32xf32, #tpu.memory_space<vmem>>, vector<1x1x32xf32>
    %88 = vector.shape_cast %87 : vector<1x1x32xf32> to vector<1x32xf32>
    %89 = vector.broadcast %88 : vector<1x32xf32> to vector<8x32xf32>
    %90 = arith.addf %86, %89 : vector<8x32xf32>
    %cst_76 = arith.constant 0.000000e+00 : f32
    %91 = vector.broadcast %cst_76 : f32 to vector<8x32xf32>
    %92 = arith.cmpf ogt, %90, %91 : vector<8x32xf32>
    %cst_77 = arith.constant 2.500000e-01 : f32
    %93 = vector.broadcast %cst_77 : f32 to vector<8x32xf32>
    %94 = arith.mulf %93, %90 : vector<8x32xf32>
    %95 = arith.select %92, %90, %94 : vector<8x32xi1>, vector<8x32xf32>
    %c2_78 = arith.constant 2 : index
    %c0_79 = arith.constant 0 : index
    %c0_80 = arith.constant 0 : index
    %96 = vector.load %arg4[%c2_78, %c0_79, %c0_80] : memref<3x32x32xf32, #tpu.memory_space<vmem>>, vector<1x32x32xf32>
    %97 = vector.shape_cast %96 : vector<1x32x32xf32> to vector<32x32xf32>
    %cst_81 = arith.constant dense<0.000000e+00> : vector<8x32xf32>
    %98 = tpu.matmul %95, %97, %cst_81 {dimension_numbers = #tpu.dot_dimension_numbers<[1], [0], [0], [1], [0, 0, 1, 1], [], []>} : vector<8x32xf32>, vector<32x32xf32>, vector<8x32xf32> -> vector<8x32xf32>
    %c2_82 = arith.constant 2 : index
    %c0_83 = arith.constant 0 : index
    %c0_84 = arith.constant 0 : index
    %99 = vector.load %arg5[%c2_82, %c0_83, %c0_84] : memref<3x1x32xf32, #tpu.memory_space<vmem>>, vector<1x1x32xf32>
    %100 = vector.shape_cast %99 : vector<1x1x32xf32> to vector<1x32xf32>
    %101 = vector.broadcast %100 : vector<1x32xf32> to vector<8x32xf32>
    %102 = arith.addf %98, %101 : vector<8x32xf32>
    %cst_85 = arith.constant 0.000000e+00 : f32
    %103 = vector.broadcast %cst_85 : f32 to vector<8x32xf32>
    %104 = arith.cmpf ogt, %102, %103 : vector<8x32xf32>
    %cst_86 = arith.constant 2.500000e-01 : f32
    %105 = vector.broadcast %cst_86 : f32 to vector<8x32xf32>
    %106 = arith.mulf %105, %102 : vector<8x32xf32>
    %107 = arith.select %104, %102, %106 : vector<8x32xi1>, vector<8x32xf32>
    %cst_87 = arith.constant dense<0.000000e+00> : vector<8x4xf32>
    %108 = tpu.matmul %107, %21, %cst_87 {dimension_numbers = #tpu.dot_dimension_numbers<[1], [1], [0], [0], [0, 0, 1, 0], [], []>} : vector<8x32xf32>, vector<4x32xf32>, vector<8x4xf32> -> vector<8x4xf32>
    %cst_88 = arith.constant dense<0.000000e+00> : vector<8x4xf32>
    %109 = tpu.matmul %107, %22, %cst_88 {dimension_numbers = #tpu.dot_dimension_numbers<[1], [1], [0], [0], [0, 0, 1, 0], [], []>} : vector<8x32xf32>, vector<4x32xf32>, vector<8x4xf32> -> vector<8x4xf32>
    %cst_89 = arith.constant dense<0.000000e+00> : vector<8x32xf32>
    %110 = tpu.matmul %107, %23, %cst_89 {dimension_numbers = #tpu.dot_dimension_numbers<[1], [1], [0], [0], [0, 0, 1, 0], [], []>} : vector<8x32xf32>, vector<32x32xf32>, vector<8x32xf32> -> vector<8x32xf32>
    %111 = arith.mulf %50, %51 : vector<8x4xf32>
    %cst_90 = arith.constant dense<0.000000e+00> : vector<8xf32>
    %112 = vector.multi_reduction <add>, %111, %cst_90 [1] : vector<8x4xf32> to vector<8xf32>
    %113 = vector.shape_cast %112 : vector<8xf32> to vector<8x1xf32>
    %114 = arith.mulf %50, %80 : vector<8x4xf32>
    %cst_91 = arith.constant dense<0.000000e+00> : vector<8xf32>
    %115 = vector.multi_reduction <add>, %114, %cst_91 [1] : vector<8x4xf32> to vector<8xf32>
    %116 = vector.shape_cast %115 : vector<8xf32> to vector<8x1xf32>
    %117 = arith.mulf %50, %109 : vector<8x4xf32>
    %cst_92 = arith.constant dense<0.000000e+00> : vector<8xf32>
    %118 = vector.multi_reduction <add>, %117, %cst_92 [1] : vector<8x4xf32> to vector<8xf32>
    %119 = vector.shape_cast %118 : vector<8xf32> to vector<8x1xf32>
    %120 = arith.mulf %79, %51 : vector<8x4xf32>
    %cst_93 = arith.constant dense<0.000000e+00> : vector<8xf32>
    %121 = vector.multi_reduction <add>, %120, %cst_93 [1] : vector<8x4xf32> to vector<8xf32>
    %122 = vector.shape_cast %121 : vector<8xf32> to vector<8x1xf32>
    %123 = arith.mulf %79, %80 : vector<8x4xf32>
    %cst_94 = arith.constant dense<0.000000e+00> : vector<8xf32>
    %124 = vector.multi_reduction <add>, %123, %cst_94 [1] : vector<8x4xf32> to vector<8xf32>
    %125 = vector.shape_cast %124 : vector<8xf32> to vector<8x1xf32>
    %126 = arith.mulf %79, %109 : vector<8x4xf32>
    %cst_95 = arith.constant dense<0.000000e+00> : vector<8xf32>
    %127 = vector.multi_reduction <add>, %126, %cst_95 [1] : vector<8x4xf32> to vector<8xf32>
    %128 = vector.shape_cast %127 : vector<8xf32> to vector<8x1xf32>
    %129 = arith.mulf %108, %51 : vector<8x4xf32>
    %cst_96 = arith.constant dense<0.000000e+00> : vector<8xf32>
    %130 = vector.multi_reduction <add>, %129, %cst_96 [1] : vector<8x4xf32> to vector<8xf32>
    %131 = vector.shape_cast %130 : vector<8xf32> to vector<8x1xf32>
    %132 = arith.mulf %108, %80 : vector<8x4xf32>
    %cst_97 = arith.constant dense<0.000000e+00> : vector<8xf32>
    %133 = vector.multi_reduction <add>, %132, %cst_97 [1] : vector<8x4xf32> to vector<8xf32>
    %134 = vector.shape_cast %133 : vector<8xf32> to vector<8x1xf32>
    %135 = arith.mulf %108, %109 : vector<8x4xf32>
    %cst_98 = arith.constant dense<0.000000e+00> : vector<8xf32>
    %136 = vector.multi_reduction <add>, %135, %cst_98 [1] : vector<8x4xf32> to vector<8xf32>
    %137 = vector.shape_cast %136 : vector<8xf32> to vector<8x1xf32>
    %cst_99 = arith.constant 0.000000e+00 : f32
    %138 = vector.broadcast %cst_99 : f32 to vector<8x32xf32>
    %139 = arith.maximumf %113, %122 : vector<8x1xf32>
    %140 = arith.maximumf %139, %131 : vector<8x1xf32>
    %141 = arith.subf %113, %140 : vector<8x1xf32>
    %142 = math.exp %141 : vector<8x1xf32>
    %143 = arith.subf %122, %140 : vector<8x1xf32>
    %144 = math.exp %143 : vector<8x1xf32>
    %145 = arith.subf %131, %140 : vector<8x1xf32>
    %146 = math.exp %145 : vector<8x1xf32>
    %147 = arith.addf %142, %144 : vector<8x1xf32>
    %148 = arith.addf %147, %146 : vector<8x1xf32>
    %cst_100 = arith.constant 1.000000e+00 : f32
    %149 = vector.broadcast %cst_100 : f32 to vector<8x1xf32>
    %150 = arith.divf %149, %148 : vector<8x1xf32>
    %151 = arith.mulf %142, %150 : vector<8x1xf32>
    %152 = vector.broadcast %151 : vector<8x1xf32> to vector<8x32xf32>
    %153 = arith.mulf %52, %152 : vector<8x32xf32>
    %154 = arith.mulf %144, %150 : vector<8x1xf32>
    %155 = vector.broadcast %154 : vector<8x1xf32> to vector<8x32xf32>
    %156 = arith.mulf %81, %155 : vector<8x32xf32>
    %157 = arith.addf %153, %156 : vector<8x32xf32>
    %158 = arith.mulf %146, %150 : vector<8x1xf32>
    %159 = vector.broadcast %158 : vector<8x1xf32> to vector<8x32xf32>
    %160 = arith.mulf %110, %159 : vector<8x32xf32>
    %161 = arith.addf %157, %160 : vector<8x32xf32>
    %cst_101 = arith.constant 5.000000e-01 : f32
    %162 = vector.broadcast %cst_101 : f32 to vector<8x32xf32>
    %163 = arith.mulf %162, %161 : vector<8x32xf32>
    %164 = arith.addf %163, %49 : vector<8x32xf32>
    %c0_102 = arith.constant 0 : index
    %c0_103 = arith.constant 0 : index
    %c0_104 = arith.constant 0 : index
    %165 = vector.load %arg9[%c0_102, %c0_103, %c0_104] : memref<3x32x32xf32, #tpu.memory_space<vmem>>, vector<1x32x32xf32>
    %166 = vector.shape_cast %165 : vector<1x32x32xf32> to vector<32x32xf32>
    %cst_105 = arith.constant dense<0.000000e+00> : vector<8x32xf32>
    %167 = tpu.matmul %164, %166, %cst_105 {dimension_numbers = #tpu.dot_dimension_numbers<[1], [0], [0], [1], [0, 0, 1, 1], [], []>} : vector<8x32xf32>, vector<32x32xf32>, vector<8x32xf32> -> vector<8x32xf32>
    %168 = arith.addf %138, %167 : vector<8x32xf32>
    %169 = arith.maximumf %116, %125 : vector<8x1xf32>
    %170 = arith.maximumf %169, %134 : vector<8x1xf32>
    %171 = arith.subf %116, %170 : vector<8x1xf32>
    %172 = math.exp %171 : vector<8x1xf32>
    %173 = arith.subf %125, %170 : vector<8x1xf32>
    %174 = math.exp %173 : vector<8x1xf32>
    %175 = arith.subf %134, %170 : vector<8x1xf32>
    %176 = math.exp %175 : vector<8x1xf32>
    %177 = arith.addf %172, %174 : vector<8x1xf32>
    %178 = arith.addf %177, %176 : vector<8x1xf32>
    %cst_106 = arith.constant 1.000000e+00 : f32
    %179 = vector.broadcast %cst_106 : f32 to vector<8x1xf32>
    %180 = arith.divf %179, %178 : vector<8x1xf32>
    %181 = arith.mulf %172, %180 : vector<8x1xf32>
    %182 = vector.broadcast %181 : vector<8x1xf32> to vector<8x32xf32>
    %183 = arith.mulf %52, %182 : vector<8x32xf32>
    %184 = arith.mulf %174, %180 : vector<8x1xf32>
    %185 = vector.broadcast %184 : vector<8x1xf32> to vector<8x32xf32>
    %186 = arith.mulf %81, %185 : vector<8x32xf32>
    %187 = arith.addf %183, %186 : vector<8x32xf32>
    %188 = arith.mulf %176, %180 : vector<8x1xf32>
    %189 = vector.broadcast %188 : vector<8x1xf32> to vector<8x32xf32>
    %190 = arith.mulf %110, %189 : vector<8x32xf32>
    %191 = arith.addf %187, %190 : vector<8x32xf32>
    %cst_107 = arith.constant 5.000000e-01 : f32
    %192 = vector.broadcast %cst_107 : f32 to vector<8x32xf32>
    %193 = arith.mulf %192, %191 : vector<8x32xf32>
    %194 = arith.addf %193, %78 : vector<8x32xf32>
    %c1_108 = arith.constant 1 : index
    %c0_109 = arith.constant 0 : index
    %c0_110 = arith.constant 0 : index
    %195 = vector.load %arg9[%c1_108, %c0_109, %c0_110] : memref<3x32x32xf32, #tpu.memory_space<vmem>>, vector<1x32x32xf32>
    %196 = vector.shape_cast %195 : vector<1x32x32xf32> to vector<32x32xf32>
    %cst_111 = arith.constant dense<0.000000e+00> : vector<8x32xf32>
    %197 = tpu.matmul %194, %196, %cst_111 {dimension_numbers = #tpu.dot_dimension_numbers<[1], [0], [0], [1], [0, 0, 1, 1], [], []>} : vector<8x32xf32>, vector<32x32xf32>, vector<8x32xf32> -> vector<8x32xf32>
    %198 = arith.addf %168, %197 : vector<8x32xf32>
    %199 = arith.maximumf %119, %128 : vector<8x1xf32>
    %200 = arith.maximumf %199, %137 : vector<8x1xf32>
    %201 = arith.subf %119, %200 : vector<8x1xf32>
    %202 = math.exp %201 : vector<8x1xf32>
    %203 = arith.subf %128, %200 : vector<8x1xf32>
    %204 = math.exp %203 : vector<8x1xf32>
    %205 = arith.subf %137, %200 : vector<8x1xf32>
    %206 = math.exp %205 : vector<8x1xf32>
    %207 = arith.addf %202, %204 : vector<8x1xf32>
    %208 = arith.addf %207, %206 : vector<8x1xf32>
    %cst_112 = arith.constant 1.000000e+00 : f32
    %209 = vector.broadcast %cst_112 : f32 to vector<8x1xf32>
    %210 = arith.divf %209, %208 : vector<8x1xf32>
    %211 = arith.mulf %202, %210 : vector<8x1xf32>
    %212 = vector.broadcast %211 : vector<8x1xf32> to vector<8x32xf32>
    %213 = arith.mulf %52, %212 : vector<8x32xf32>
    %214 = arith.mulf %204, %210 : vector<8x1xf32>
    %215 = vector.broadcast %214 : vector<8x1xf32> to vector<8x32xf32>
    %216 = arith.mulf %81, %215 : vector<8x32xf32>
    %217 = arith.addf %213, %216 : vector<8x32xf32>
    %218 = arith.mulf %206, %210 : vector<8x1xf32>
    %219 = vector.broadcast %218 : vector<8x1xf32> to vector<8x32xf32>
    %220 = arith.mulf %110, %219 : vector<8x32xf32>
    %221 = arith.addf %217, %220 : vector<8x32xf32>
    %cst_113 = arith.constant 5.000000e-01 : f32
    %222 = vector.broadcast %cst_113 : f32 to vector<8x32xf32>
    %223 = arith.mulf %222, %221 : vector<8x32xf32>
    %224 = arith.addf %223, %107 : vector<8x32xf32>
    %c2_114 = arith.constant 2 : index
    %c0_115 = arith.constant 0 : index
    %c0_116 = arith.constant 0 : index
    %225 = vector.load %arg9[%c2_114, %c0_115, %c0_116] : memref<3x32x32xf32, #tpu.memory_space<vmem>>, vector<1x32x32xf32>
    %226 = vector.shape_cast %225 : vector<1x32x32xf32> to vector<32x32xf32>
    %cst_117 = arith.constant dense<0.000000e+00> : vector<8x32xf32>
    %227 = tpu.matmul %224, %226, %cst_117 {dimension_numbers = #tpu.dot_dimension_numbers<[1], [0], [0], [1], [0, 0, 1, 1], [], []>} : vector<8x32xf32>, vector<32x32xf32>, vector<8x32xf32> -> vector<8x32xf32>
    %228 = arith.addf %198, %227 : vector<8x32xf32>
    %c0_118 = arith.constant 0 : index
    %c0_119 = arith.constant 0 : index
    %229 = vector.load %arg10[%c0_118, %c0_119] : memref<1x32xf32, #tpu.memory_space<vmem>>, vector<1x32xf32>
    %230 = vector.broadcast %229 : vector<1x32xf32> to vector<8x32xf32>
    %231 = arith.addf %228, %230 : vector<8x32xf32>
    %c0_120 = arith.constant 0 : index
    %c0_121 = arith.constant 0 : index
    %232 = vector.load %arg16[%c0_120, %c0_121] : memref<4x32xf32, #tpu.memory_space<vmem>>, vector<4x32xf32>
    %c0_122 = arith.constant 0 : index
    %c0_123 = arith.constant 0 : index
    %233 = vector.load %arg17[%c0_122, %c0_123] : memref<4x32xf32, #tpu.memory_space<vmem>>, vector<4x32xf32>
    %c0_124 = arith.constant 0 : index
    %c0_125 = arith.constant 0 : index
    %234 = vector.load %arg18[%c0_124, %c0_125] : memref<32x32xf32, #tpu.memory_space<vmem>>, vector<32x32xf32>
    %c0_126 = arith.constant 0 : index
    %c0_127 = arith.constant 0 : index
    %c0_128 = arith.constant 0 : index
    %235 = vector.load %arg11[%c0_126, %c0_127, %c0_128] : memref<2x8x16xf32, #tpu.memory_space<vmem>>, vector<1x8x16xf32>
    %236 = vector.shape_cast %235 : vector<1x8x16xf32> to vector<8x16xf32>
    %c0_129 = arith.constant 0 : index
    %c0_130 = arith.constant 0 : index
    %c0_131 = arith.constant 0 : index
    %237 = vector.load %arg12[%c0_129, %c0_130, %c0_131] : memref<2x16x32xf32, #tpu.memory_space<vmem>>, vector<1x16x32xf32>
    %238 = vector.shape_cast %237 : vector<1x16x32xf32> to vector<16x32xf32>
    %cst_132 = arith.constant dense<0.000000e+00> : vector<8x32xf32>
    %239 = tpu.matmul %236, %238, %cst_132 {dimension_numbers = #tpu.dot_dimension_numbers<[1], [0], [0], [1], [0, 0, 1, 1], [], []>} : vector<8x16xf32>, vector<16x32xf32>, vector<8x32xf32> -> vector<8x32xf32>
    %c0_133 = arith.constant 0 : index
    %c0_134 = arith.constant 0 : index
    %c0_135 = arith.constant 0 : index
    %240 = vector.load %arg13[%c0_133, %c0_134, %c0_135] : memref<2x1x32xf32, #tpu.memory_space<vmem>>, vector<1x1x32xf32>
    %241 = vector.shape_cast %240 : vector<1x1x32xf32> to vector<1x32xf32>
    %242 = vector.broadcast %241 : vector<1x32xf32> to vector<8x32xf32>
    %243 = arith.addf %239, %242 : vector<8x32xf32>
    %cst_136 = arith.constant 0.000000e+00 : f32
    %244 = vector.broadcast %cst_136 : f32 to vector<8x32xf32>
    %245 = arith.cmpf ogt, %243, %244 : vector<8x32xf32>
    %cst_137 = arith.constant 2.500000e-01 : f32
    %246 = vector.broadcast %cst_137 : f32 to vector<8x32xf32>
    %247 = arith.mulf %246, %243 : vector<8x32xf32>
    %248 = arith.select %245, %243, %247 : vector<8x32xi1>, vector<8x32xf32>
    %c0_138 = arith.constant 0 : index
    %c0_139 = arith.constant 0 : index
    %c0_140 = arith.constant 0 : index
    %249 = vector.load %arg14[%c0_138, %c0_139, %c0_140] : memref<2x32x32xf32, #tpu.memory_space<vmem>>, vector<1x32x32xf32>
    %250 = vector.shape_cast %249 : vector<1x32x32xf32> to vector<32x32xf32>
    %cst_141 = arith.constant dense<0.000000e+00> : vector<8x32xf32>
    %251 = tpu.matmul %248, %250, %cst_141 {dimension_numbers = #tpu.dot_dimension_numbers<[1], [0], [0], [1], [0, 0, 1, 1], [], []>} : vector<8x32xf32>, vector<32x32xf32>, vector<8x32xf32> -> vector<8x32xf32>
    %c0_142 = arith.constant 0 : index
    %c0_143 = arith.constant 0 : index
    %c0_144 = arith.constant 0 : index
    %252 = vector.load %arg15[%c0_142, %c0_143, %c0_144] : memref<2x1x32xf32, #tpu.memory_space<vmem>>, vector<1x1x32xf32>
    %253 = vector.shape_cast %252 : vector<1x1x32xf32> to vector<1x32xf32>
    %254 = vector.broadcast %253 : vector<1x32xf32> to vector<8x32xf32>
    %255 = arith.addf %251, %254 : vector<8x32xf32>
    %cst_145 = arith.constant 0.000000e+00 : f32
    %256 = vector.broadcast %cst_145 : f32 to vector<8x32xf32>
    %257 = arith.cmpf ogt, %255, %256 : vector<8x32xf32>
    %cst_146 = arith.constant 2.500000e-01 : f32
    %258 = vector.broadcast %cst_146 : f32 to vector<8x32xf32>
    %259 = arith.mulf %258, %255 : vector<8x32xf32>
    %260 = arith.select %257, %255, %259 : vector<8x32xi1>, vector<8x32xf32>
    %cst_147 = arith.constant dense<0.000000e+00> : vector<8x4xf32>
    %261 = tpu.matmul %260, %232, %cst_147 {dimension_numbers = #tpu.dot_dimension_numbers<[1], [1], [0], [0], [0, 0, 1, 0], [], []>} : vector<8x32xf32>, vector<4x32xf32>, vector<8x4xf32> -> vector<8x4xf32>
    %cst_148 = arith.constant dense<0.000000e+00> : vector<8x4xf32>
    %262 = tpu.matmul %260, %233, %cst_148 {dimension_numbers = #tpu.dot_dimension_numbers<[1], [1], [0], [0], [0, 0, 1, 0], [], []>} : vector<8x32xf32>, vector<4x32xf32>, vector<8x4xf32> -> vector<8x4xf32>
    %cst_149 = arith.constant dense<0.000000e+00> : vector<8x32xf32>
    %263 = tpu.matmul %260, %234, %cst_149 {dimension_numbers = #tpu.dot_dimension_numbers<[1], [1], [0], [0], [0, 0, 1, 0], [], []>} : vector<8x32xf32>, vector<32x32xf32>, vector<8x32xf32> -> vector<8x32xf32>
    %c1_150 = arith.constant 1 : index
    %c0_151 = arith.constant 0 : index
    %c0_152 = arith.constant 0 : index
    %264 = vector.load %arg11[%c1_150, %c0_151, %c0_152] : memref<2x8x16xf32, #tpu.memory_space<vmem>>, vector<1x8x16xf32>
    %265 = vector.shape_cast %264 : vector<1x8x16xf32> to vector<8x16xf32>
    %c1_153 = arith.constant 1 : index
    %c0_154 = arith.constant 0 : index
    %c0_155 = arith.constant 0 : index
    %266 = vector.load %arg12[%c1_153, %c0_154, %c0_155] : memref<2x16x32xf32, #tpu.memory_space<vmem>>, vector<1x16x32xf32>
    %267 = vector.shape_cast %266 : vector<1x16x32xf32> to vector<16x32xf32>
    %cst_156 = arith.constant dense<0.000000e+00> : vector<8x32xf32>
    %268 = tpu.matmul %265, %267, %cst_156 {dimension_numbers = #tpu.dot_dimension_numbers<[1], [0], [0], [1], [0, 0, 1, 1], [], []>} : vector<8x16xf32>, vector<16x32xf32>, vector<8x32xf32> -> vector<8x32xf32>
    %c1_157 = arith.constant 1 : index
    %c0_158 = arith.constant 0 : index
    %c0_159 = arith.constant 0 : index
    %269 = vector.load %arg13[%c1_157, %c0_158, %c0_159] : memref<2x1x32xf32, #tpu.memory_space<vmem>>, vector<1x1x32xf32>
    %270 = vector.shape_cast %269 : vector<1x1x32xf32> to vector<1x32xf32>
    %271 = vector.broadcast %270 : vector<1x32xf32> to vector<8x32xf32>
    %272 = arith.addf %268, %271 : vector<8x32xf32>
    %cst_160 = arith.constant 0.000000e+00 : f32
    %273 = vector.broadcast %cst_160 : f32 to vector<8x32xf32>
    %274 = arith.cmpf ogt, %272, %273 : vector<8x32xf32>
    %cst_161 = arith.constant 2.500000e-01 : f32
    %275 = vector.broadcast %cst_161 : f32 to vector<8x32xf32>
    %276 = arith.mulf %275, %272 : vector<8x32xf32>
    %277 = arith.select %274, %272, %276 : vector<8x32xi1>, vector<8x32xf32>
    %c1_162 = arith.constant 1 : index
    %c0_163 = arith.constant 0 : index
    %c0_164 = arith.constant 0 : index
    %278 = vector.load %arg14[%c1_162, %c0_163, %c0_164] : memref<2x32x32xf32, #tpu.memory_space<vmem>>, vector<1x32x32xf32>
    %279 = vector.shape_cast %278 : vector<1x32x32xf32> to vector<32x32xf32>
    %cst_165 = arith.constant dense<0.000000e+00> : vector<8x32xf32>
    %280 = tpu.matmul %277, %279, %cst_165 {dimension_numbers = #tpu.dot_dimension_numbers<[1], [0], [0], [1], [0, 0, 1, 1], [], []>} : vector<8x32xf32>, vector<32x32xf32>, vector<8x32xf32> -> vector<8x32xf32>
    %c1_166 = arith.constant 1 : index
    %c0_167 = arith.constant 0 : index
    %c0_168 = arith.constant 0 : index
    %281 = vector.load %arg15[%c1_166, %c0_167, %c0_168] : memref<2x1x32xf32, #tpu.memory_space<vmem>>, vector<1x1x32xf32>
    %282 = vector.shape_cast %281 : vector<1x1x32xf32> to vector<1x32xf32>
    %283 = vector.broadcast %282 : vector<1x32xf32> to vector<8x32xf32>
    %284 = arith.addf %280, %283 : vector<8x32xf32>
    %cst_169 = arith.constant 0.000000e+00 : f32
    %285 = vector.broadcast %cst_169 : f32 to vector<8x32xf32>
    %286 = arith.cmpf ogt, %284, %285 : vector<8x32xf32>
    %cst_170 = arith.constant 2.500000e-01 : f32
    %287 = vector.broadcast %cst_170 : f32 to vector<8x32xf32>
    %288 = arith.mulf %287, %284 : vector<8x32xf32>
    %289 = arith.select %286, %284, %288 : vector<8x32xi1>, vector<8x32xf32>
    %cst_171 = arith.constant dense<0.000000e+00> : vector<8x4xf32>
    %290 = tpu.matmul %289, %232, %cst_171 {dimension_numbers = #tpu.dot_dimension_numbers<[1], [1], [0], [0], [0, 0, 1, 0], [], []>} : vector<8x32xf32>, vector<4x32xf32>, vector<8x4xf32> -> vector<8x4xf32>
    %cst_172 = arith.constant dense<0.000000e+00> : vector<8x4xf32>
    %291 = tpu.matmul %289, %233, %cst_172 {dimension_numbers = #tpu.dot_dimension_numbers<[1], [1], [0], [0], [0, 0, 1, 0], [], []>} : vector<8x32xf32>, vector<4x32xf32>, vector<8x4xf32> -> vector<8x4xf32>
    %cst_173 = arith.constant dense<0.000000e+00> : vector<8x32xf32>
    %292 = tpu.matmul %289, %234, %cst_173 {dimension_numbers = #tpu.dot_dimension_numbers<[1], [1], [0], [0], [0, 0, 1, 0], [], []>} : vector<8x32xf32>, vector<32x32xf32>, vector<8x32xf32> -> vector<8x32xf32>
    %293 = arith.mulf %261, %262 : vector<8x4xf32>
    %cst_174 = arith.constant dense<0.000000e+00> : vector<8xf32>
    %294 = vector.multi_reduction <add>, %293, %cst_174 [1] : vector<8x4xf32> to vector<8xf32>
    %295 = vector.shape_cast %294 : vector<8xf32> to vector<8x1xf32>
    %296 = arith.mulf %261, %291 : vector<8x4xf32>
    %cst_175 = arith.constant dense<0.000000e+00> : vector<8xf32>
    %297 = vector.multi_reduction <add>, %296, %cst_175 [1] : vector<8x4xf32> to vector<8xf32>
    %298 = vector.shape_cast %297 : vector<8xf32> to vector<8x1xf32>
    %299 = arith.mulf %290, %262 : vector<8x4xf32>
    %cst_176 = arith.constant dense<0.000000e+00> : vector<8xf32>
    %300 = vector.multi_reduction <add>, %299, %cst_176 [1] : vector<8x4xf32> to vector<8xf32>
    %301 = vector.shape_cast %300 : vector<8xf32> to vector<8x1xf32>
    %302 = arith.mulf %290, %291 : vector<8x4xf32>
    %cst_177 = arith.constant dense<0.000000e+00> : vector<8xf32>
    %303 = vector.multi_reduction <add>, %302, %cst_177 [1] : vector<8x4xf32> to vector<8xf32>
    %304 = vector.shape_cast %303 : vector<8xf32> to vector<8x1xf32>
    %cst_178 = arith.constant 0.000000e+00 : f32
    %305 = vector.broadcast %cst_178 : f32 to vector<8x32xf32>
    %306 = arith.maximumf %295, %301 : vector<8x1xf32>
    %307 = arith.subf %295, %306 : vector<8x1xf32>
    %308 = math.exp %307 : vector<8x1xf32>
    %309 = arith.subf %301, %306 : vector<8x1xf32>
    %310 = math.exp %309 : vector<8x1xf32>
    %311 = arith.addf %308, %310 : vector<8x1xf32>
    %cst_179 = arith.constant 1.000000e+00 : f32
    %312 = vector.broadcast %cst_179 : f32 to vector<8x1xf32>
    %313 = arith.divf %312, %311 : vector<8x1xf32>
    %314 = arith.mulf %308, %313 : vector<8x1xf32>
    %315 = vector.broadcast %314 : vector<8x1xf32> to vector<8x32xf32>
    %316 = arith.mulf %263, %315 : vector<8x32xf32>
    %317 = arith.mulf %310, %313 : vector<8x1xf32>
    %318 = vector.broadcast %317 : vector<8x1xf32> to vector<8x32xf32>
    %319 = arith.mulf %292, %318 : vector<8x32xf32>
    %320 = arith.addf %316, %319 : vector<8x32xf32>
    %cst_180 = arith.constant 5.000000e-01 : f32
    %321 = vector.broadcast %cst_180 : f32 to vector<8x32xf32>
    %322 = arith.mulf %321, %320 : vector<8x32xf32>
    %323 = arith.addf %322, %260 : vector<8x32xf32>
    %c0_181 = arith.constant 0 : index
    %c0_182 = arith.constant 0 : index
    %c0_183 = arith.constant 0 : index
    %324 = vector.load %arg19[%c0_181, %c0_182, %c0_183] : memref<2x32x32xf32, #tpu.memory_space<vmem>>, vector<1x32x32xf32>
    %325 = vector.shape_cast %324 : vector<1x32x32xf32> to vector<32x32xf32>
    %cst_184 = arith.constant dense<0.000000e+00> : vector<8x32xf32>
    %326 = tpu.matmul %323, %325, %cst_184 {dimension_numbers = #tpu.dot_dimension_numbers<[1], [0], [0], [1], [0, 0, 1, 1], [], []>} : vector<8x32xf32>, vector<32x32xf32>, vector<8x32xf32> -> vector<8x32xf32>
    %327 = arith.addf %305, %326 : vector<8x32xf32>
    %328 = arith.maximumf %298, %304 : vector<8x1xf32>
    %329 = arith.subf %298, %328 : vector<8x1xf32>
    %330 = math.exp %329 : vector<8x1xf32>
    %331 = arith.subf %304, %328 : vector<8x1xf32>
    %332 = math.exp %331 : vector<8x1xf32>
    %333 = arith.addf %330, %332 : vector<8x1xf32>
    %cst_185 = arith.constant 1.000000e+00 : f32
    %334 = vector.broadcast %cst_185 : f32 to vector<8x1xf32>
    %335 = arith.divf %334, %333 : vector<8x1xf32>
    %336 = arith.mulf %330, %335 : vector<8x1xf32>
    %337 = vector.broadcast %336 : vector<8x1xf32> to vector<8x32xf32>
    %338 = arith.mulf %263, %337 : vector<8x32xf32>
    %339 = arith.mulf %332, %335 : vector<8x1xf32>
    %340 = vector.broadcast %339 : vector<8x1xf32> to vector<8x32xf32>
    %341 = arith.mulf %292, %340 : vector<8x32xf32>
    %342 = arith.addf %338, %341 : vector<8x32xf32>
    %cst_186 = arith.constant 5.000000e-01 : f32
    %343 = vector.broadcast %cst_186 : f32 to vector<8x32xf32>
    %344 = arith.mulf %343, %342 : vector<8x32xf32>
    %345 = arith.addf %344, %289 : vector<8x32xf32>
    %c1_187 = arith.constant 1 : index
    %c0_188 = arith.constant 0 : index
    %c0_189 = arith.constant 0 : index
    %346 = vector.load %arg19[%c1_187, %c0_188, %c0_189] : memref<2x32x32xf32, #tpu.memory_space<vmem>>, vector<1x32x32xf32>
    %347 = vector.shape_cast %346 : vector<1x32x32xf32> to vector<32x32xf32>
    %cst_190 = arith.constant dense<0.000000e+00> : vector<8x32xf32>
    %348 = tpu.matmul %345, %347, %cst_190 {dimension_numbers = #tpu.dot_dimension_numbers<[1], [0], [0], [1], [0, 0, 1, 1], [], []>} : vector<8x32xf32>, vector<32x32xf32>, vector<8x32xf32> -> vector<8x32xf32>
    %349 = arith.addf %327, %348 : vector<8x32xf32>
    %c0_191 = arith.constant 0 : index
    %c0_192 = arith.constant 0 : index
    %350 = vector.load %arg20[%c0_191, %c0_192] : memref<1x32xf32, #tpu.memory_space<vmem>>, vector<1x32xf32>
    %351 = vector.broadcast %350 : vector<1x32xf32> to vector<8x32xf32>
    %352 = arith.addf %349, %351 : vector<8x32xf32>
    %cst_193 = arith.constant 0.000000e+00 : f32
    %353 = vector.broadcast %cst_193 : f32 to vector<8x32xf32>
    %354 = arith.cmpf ogt, %20, %353 : vector<8x32xf32>
    %cst_194 = arith.constant 2.500000e-01 : f32
    %355 = vector.broadcast %cst_194 : f32 to vector<8x32xf32>
    %356 = arith.mulf %355, %20 : vector<8x32xf32>
    %357 = arith.select %354, %20, %356 : vector<8x32xi1>, vector<8x32xf32>
    %c0_195 = arith.constant 0 : index
    %c0_196 = arith.constant 0 : index
    %c0_197 = arith.constant 0 : index
    %358 = vector.load %arg26[%c0_195, %c0_196, %c0_197] : memref<3x32x32xf32, #tpu.memory_space<vmem>>, vector<1x32x32xf32>
    %359 = vector.shape_cast %358 : vector<1x32x32xf32> to vector<32x32xf32>
    %cst_198 = arith.constant dense<0.000000e+00> : vector<8x32xf32>
    %360 = tpu.matmul %357, %359, %cst_198 {dimension_numbers = #tpu.dot_dimension_numbers<[1], [0], [0], [1], [0, 0, 1, 1], [], []>} : vector<8x32xf32>, vector<32x32xf32>, vector<8x32xf32> -> vector<8x32xf32>
    %cst_199 = arith.constant 0.000000e+00 : f32
    %361 = vector.broadcast %cst_199 : f32 to vector<8x32xf32>
    %362 = arith.cmpf ogt, %231, %361 : vector<8x32xf32>
    %cst_200 = arith.constant 2.500000e-01 : f32
    %363 = vector.broadcast %cst_200 : f32 to vector<8x32xf32>
    %364 = arith.mulf %363, %231 : vector<8x32xf32>
    %365 = arith.select %362, %231, %364 : vector<8x32xi1>, vector<8x32xf32>
    %c1_201 = arith.constant 1 : index
    %c0_202 = arith.constant 0 : index
    %c0_203 = arith.constant 0 : index
    %366 = vector.load %arg26[%c1_201, %c0_202, %c0_203] : memref<3x32x32xf32, #tpu.memory_space<vmem>>, vector<1x32x32xf32>
    %367 = vector.shape_cast %366 : vector<1x32x32xf32> to vector<32x32xf32>
    %cst_204 = arith.constant dense<0.000000e+00> : vector<8x32xf32>
    %368 = tpu.matmul %365, %367, %cst_204 {dimension_numbers = #tpu.dot_dimension_numbers<[1], [0], [0], [1], [0, 0, 1, 1], [], []>} : vector<8x32xf32>, vector<32x32xf32>, vector<8x32xf32> -> vector<8x32xf32>
    %369 = arith.addf %360, %368 : vector<8x32xf32>
    %cst_205 = arith.constant 0.000000e+00 : f32
    %370 = vector.broadcast %cst_205 : f32 to vector<8x32xf32>
    %371 = arith.cmpf ogt, %352, %370 : vector<8x32xf32>
    %cst_206 = arith.constant 2.500000e-01 : f32
    %372 = vector.broadcast %cst_206 : f32 to vector<8x32xf32>
    %373 = arith.mulf %372, %352 : vector<8x32xf32>
    %374 = arith.select %371, %352, %373 : vector<8x32xi1>, vector<8x32xf32>
    %c2_207 = arith.constant 2 : index
    %c0_208 = arith.constant 0 : index
    %c0_209 = arith.constant 0 : index
    %375 = vector.load %arg26[%c2_207, %c0_208, %c0_209] : memref<3x32x32xf32, #tpu.memory_space<vmem>>, vector<1x32x32xf32>
    %376 = vector.shape_cast %375 : vector<1x32x32xf32> to vector<32x32xf32>
    %cst_210 = arith.constant dense<0.000000e+00> : vector<8x32xf32>
    %377 = tpu.matmul %374, %376, %cst_210 {dimension_numbers = #tpu.dot_dimension_numbers<[1], [0], [0], [1], [0, 0, 1, 1], [], []>} : vector<8x32xf32>, vector<32x32xf32>, vector<8x32xf32> -> vector<8x32xf32>
    %378 = arith.addf %369, %377 : vector<8x32xf32>
    %c0_211 = arith.constant 0 : index
    %c0_212 = arith.constant 0 : index
    %379 = vector.load %arg27[%c0_211, %c0_212] : memref<1x32xf32, #tpu.memory_space<vmem>>, vector<1x32xf32>
    %380 = vector.broadcast %379 : vector<1x32xf32> to vector<8x32xf32>
    %381 = arith.addf %378, %380 : vector<8x32xf32>
    %cst_213 = arith.constant 0.000000e+00 : f32
    %382 = vector.broadcast %cst_213 : f32 to vector<8x32xf32>
    %383 = arith.cmpf ogt, %381, %382 : vector<8x32xf32>
    %cst_214 = arith.constant 2.500000e-01 : f32
    %384 = vector.broadcast %cst_214 : f32 to vector<8x32xf32>
    %385 = arith.mulf %384, %381 : vector<8x32xf32>
    %386 = arith.select %383, %381, %385 : vector<8x32xi1>, vector<8x32xf32>
    %c0_215 = arith.constant 0 : index
    %c0_216 = arith.constant 0 : index
    %387 = vector.load %arg28[%c0_215, %c0_216] : memref<32x32xf32, #tpu.memory_space<vmem>>, vector<32x32xf32>
    %cst_217 = arith.constant dense<0.000000e+00> : vector<8x32xf32>
    %388 = tpu.matmul %386, %387, %cst_217 {dimension_numbers = #tpu.dot_dimension_numbers<[1], [0], [0], [1], [0, 0, 1, 1], [], []>} : vector<8x32xf32>, vector<32x32xf32>, vector<8x32xf32> -> vector<8x32xf32>
    %c0_218 = arith.constant 0 : index
    %c0_219 = arith.constant 0 : index
    %389 = vector.load %arg29[%c0_218, %c0_219] : memref<1x32xf32, #tpu.memory_space<vmem>>, vector<1x32xf32>
    %390 = vector.broadcast %389 : vector<1x32xf32> to vector<8x32xf32>
    %391 = arith.addf %388, %390 : vector<8x32xf32>
    %cst_220 = arith.constant 0.000000e+00 : f32
    %392 = vector.broadcast %cst_220 : f32 to vector<8x32xf32>
    %393 = arith.cmpf ogt, %391, %392 : vector<8x32xf32>
    %cst_221 = arith.constant 2.500000e-01 : f32
    %394 = vector.broadcast %cst_221 : f32 to vector<8x32xf32>
    %395 = arith.mulf %394, %391 : vector<8x32xf32>
    %396 = arith.select %393, %391, %395 : vector<8x32xi1>, vector<8x32xf32>
    %c0_222 = arith.constant 0 : index
    %c0_223 = arith.constant 0 : index
    %397 = vector.load %arg30[%c0_222, %c0_223] : memref<8x32xf32, #tpu.memory_space<vmem>>, vector<8x32xf32>
    tpu.vector_store %arg30[%c0_222, %c0_223], %396 {strides = array<i32>} : memref<8x32xf32, #tpu.memory_space<vmem>>, vector<8x32xf32>,
    return
  }
  func.func @transform_0(%arg0: i32) -> (i32, i32, i32) {
    %c0_i32 = arith.constant 0 : i32
    %c0_i32_0 = arith.constant 0 : i32
    %c0_i32_1 = arith.constant 0 : i32
    return %c0_i32, %arg0, %c0_i32_0 : i32, i32, i32
  }
  func.func @transform_1(%arg0: i32) -> (i32, i32, i32) {
    %c0_i32 = arith.constant 0 : i32
    %c0_i32_0 = arith.constant 0 : i32
    %c0_i32_1 = arith.constant 0 : i32
    %c0_i32_2 = arith.constant 0 : i32
    return %c0_i32, %c0_i32_0, %c0_i32_1 : i32, i32, i32
  }
  func.func @transform_2(%arg0: i32) -> (i32, i32, i32) {
    %c0_i32 = arith.constant 0 : i32
    %c0_i32_0 = arith.constant 0 : i32
    %c0_i32_1 = arith.constant 0 : i32
    %c0_i32_2 = arith.constant 0 : i32
    return %c0_i32, %c0_i32_0, %c0_i32_1 : i32, i32, i32
  }
  func.func @transform_3(%arg0: i32) -> (i32, i32, i32) {
    %c0_i32 = arith.constant 0 : i32
    %c0_i32_0 = arith.constant 0 : i32
    %c0_i32_1 = arith.constant 0 : i32
    %c0_i32_2 = arith.constant 0 : i32
    return %c0_i32, %c0_i32_0, %c0_i32_1 : i32, i32, i32
  }
  func.func @transform_4(%arg0: i32) -> (i32, i32, i32) {
    %c0_i32 = arith.constant 0 : i32
    %c0_i32_0 = arith.constant 0 : i32
    %c0_i32_1 = arith.constant 0 : i32
    %c0_i32_2 = arith.constant 0 : i32
    return %c0_i32, %c0_i32_0, %c0_i32_1 : i32, i32, i32
  }
  func.func @transform_5(%arg0: i32) -> (i32, i32) {
    %c0_i32 = arith.constant 0 : i32
    %c0_i32_0 = arith.constant 0 : i32
    %c0_i32_1 = arith.constant 0 : i32
    return %c0_i32, %c0_i32_0 : i32, i32
  }
  func.func @transform_6(%arg0: i32) -> (i32, i32) {
    %c0_i32 = arith.constant 0 : i32
    %c0_i32_0 = arith.constant 0 : i32
    %c0_i32_1 = arith.constant 0 : i32
    return %c0_i32, %c0_i32_0 : i32, i32
  }
  func.func @transform_7(%arg0: i32) -> (i32, i32) {
    %c0_i32 = arith.constant 0 : i32
    %c0_i32_0 = arith.constant 0 : i32
    %c0_i32_1 = arith.constant 0 : i32
    return %c0_i32, %c0_i32_0 : i32, i32
  }
  func.func @transform_8(%arg0: i32) -> (i32, i32, i32) {
    %c0_i32 = arith.constant 0 : i32
    %c0_i32_0 = arith.constant 0 : i32
    %c0_i32_1 = arith.constant 0 : i32
    %c0_i32_2 = arith.constant 0 : i32
    return %c0_i32, %c0_i32_0, %c0_i32_1 : i32, i32, i32
  }
  func.func @transform_9(%arg0: i32) -> (i32, i32) {
    %c0_i32 = arith.constant 0 : i32
    %c0_i32_0 = arith.constant 0 : i32
    %c0_i32_1 = arith.constant 0 : i32
    return %c0_i32, %c0_i32_0 : i32, i32
  }
  func.func @transform_10(%arg0: i32) -> (i32, i32, i32) {
    %c0_i32 = arith.constant 0 : i32
    %c0_i32_0 = arith.constant 0 : i32
    %c0_i32_1 = arith.constant 0 : i32
    return %c0_i32, %arg0, %c0_i32_0 : i32, i32, i32
  }
  func.func @transform_11(%arg0: i32) -> (i32, i32, i32) {
    %c0_i32 = arith.constant 0 : i32
    %c0_i32_0 = arith.constant 0 : i32
    %c0_i32_1 = arith.constant 0 : i32
    %c0_i32_2 = arith.constant 0 : i32
    return %c0_i32, %c0_i32_0, %c0_i32_1 : i32, i32, i32
  }
  func.func @transform_12(%arg0: i32) -> (i32, i32, i32) {
    %c0_i32 = arith.constant 0 : i32
    %c0_i32_0 = arith.constant 0 : i32
    %c0_i32_1 = arith.constant 0 : i32
    %c0_i32_2 = arith.constant 0 : i32
    return %c0_i32, %c0_i32_0, %c0_i32_1 : i32, i32, i32
  }
  func.func @transform_13(%arg0: i32) -> (i32, i32, i32) {
    %c0_i32 = arith.constant 0 : i32
    %c0_i32_0 = arith.constant 0 : i32
    %c0_i32_1 = arith.constant 0 : i32
    %c0_i32_2 = arith.constant 0 : i32
    return %c0_i32, %c0_i32_0, %c0_i32_1 : i32, i32, i32
  }
  func.func @transform_14(%arg0: i32) -> (i32, i32, i32) {
    %c0_i32 = arith.constant 0 : i32
    %c0_i32_0 = arith.constant 0 : i32
    %c0_i32_1 = arith.constant 0 : i32
    %c0_i32_2 = arith.constant 0 : i32
    return %c0_i32, %c0_i32_0, %c0_i32_1 : i32, i32, i32
  }
  func.func @transform_15(%arg0: i32) -> (i32, i32) {
    %c0_i32 = arith.constant 0 : i32
    %c0_i32_0 = arith.constant 0 : i32
    %c0_i32_1 = arith.constant 0 : i32
    return %c0_i32, %c0_i32_0 : i32, i32
  }
  func.func @transform_16(%arg0: i32) -> (i32, i32) {
    %c0_i32 = arith.constant 0 : i32
    %c0_i32_0 = arith.constant 0 : i32
    %c0_i32_1 = arith.constant 0 : i32
    return %c0_i32, %c0_i32_0 : i32, i32
  }
  func.func @transform_17(%arg0: i32) -> (i32, i32) {
    %c0_i32 = arith.constant 0 : i32
    %c0_i32_0 = arith.constant 0 : i32
    %c0_i32_1 = arith.constant 0 : i32
    return %c0_i32, %c0_i32_0 : i32, i32
  }
  func.func @transform_18(%arg0: i32) -> (i32, i32, i32) {
    %c0_i32 = arith.constant 0 : i32
    %c0_i32_0 = arith.constant 0 : i32
    %c0_i32_1 = arith.constant 0 : i32
    %c0_i32_2 = arith.constant 0 : i32
    return %c0_i32, %c0_i32_0, %c0_i32_1 : i32, i32, i32
  }
  func.func @transform_19(%arg0: i32) -> (i32, i32) {
    %c0_i32 = arith.constant 0 : i32
    %c0_i32_0 = arith.constant 0 : i32
    %c0_i32_1 = arith.constant 0 : i32
    return %c0_i32, %c0_i32_0 : i32, i32
  }
  func.func @transform_20(%arg0: i32) -> (i32, i32) {
    %c0_i32 = arith.constant 0 : i32
    %c0_i32_0 = arith.constant 0 : i32
    return %arg0, %c0_i32 : i32, i32
  }
  func.func @transform_21(%arg0: i32) -> (i32, i32) {
    %c0_i32 = arith.constant 0 : i32
    %c0_i32_0 = arith.constant 0 : i32
    %c0_i32_1 = arith.constant 0 : i32
    return %c0_i32, %c0_i32_0 : i32, i32
  }
  func.func @transform_22(%arg0: i32) -> (i32, i32) {
    %c0_i32 = arith.constant 0 : i32
    %c0_i32_0 = arith.constant 0 : i32
    %c0_i32_1 = arith.constant 0 : i32
    return %c0_i32, %c0_i32_0 : i32, i32
  }
  func.func @transform_23(%arg0: i32) -> (i32, i32) {
    %c0_i32 = arith.constant 0 : i32
    %c0_i32_0 = arith.constant 0 : i32
    %c0_i32_1 = arith.constant 0 : i32
    return %c0_i32, %c0_i32_0 : i32, i32
  }
  func.func @transform_24(%arg0: i32) -> (i32, i32) {
    %c0_i32 = arith.constant 0 : i32
    %c0_i32_0 = arith.constant 0 : i32
    %c0_i32_1 = arith.constant 0 : i32
    return %c0_i32, %c0_i32_0 : i32, i32
  }
  func.func @transform_25(%arg0: i32) -> (i32, i32, i32) {
    %c0_i32 = arith.constant 0 : i32
    %c0_i32_0 = arith.constant 0 : i32
    %c0_i32_1 = arith.constant 0 : i32
    %c0_i32_2 = arith.constant 0 : i32
    return %c0_i32, %c0_i32_0, %c0_i32_1 : i32, i32, i32
  }
  func.func @transform_26(%arg0: i32) -> (i32, i32) {
    %c0_i32 = arith.constant 0 : i32
    %c0_i32_0 = arith.constant 0 : i32
    %c0_i32_1 = arith.constant 0 : i32
    return %c0_i32, %c0_i32_0 : i32, i32
  }
  func.func @transform_27(%arg0: i32) -> (i32, i32) {
    %c0_i32 = arith.constant 0 : i32
    %c0_i32_0 = arith.constant 0 : i32
    %c0_i32_1 = arith.constant 0 : i32
    return %c0_i32, %c0_i32_0 : i32, i32
  }
  func.func @transform_28(%arg0: i32) -> (i32, i32) {
    %c0_i32 = arith.constant 0 : i32
    %c0_i32_0 = arith.constant 0 : i32
    %c0_i32_1 = arith.constant 0 : i32
    return %c0_i32, %c0_i32_0 : i32, i32
  }
  func.func @transform_29(%arg0: i32) -> (i32, i32) {
    %c0_i32 = arith.constant 0 : i32
    %c0_i32_0 = arith.constant 0 : i32
    return %arg0, %c0_i32 : i32, i32
  }
}

</mosaic_0001>

<bundles_post_ra>
// kernel: tpu_custom_call.1
= control target key start
LH: loop header
LB: loop body
LE: loop exit
PB: predicated region body
PF: predicated region fallthrough
CT: control target
= control target key end

     0   :  { %s2520_s6 = smov 1   ;;  %s2521_s10 = smov 2   ;;  %s3089_s0 = inlined_call_operand.smem [shape: u32[30], index: -1, kind: input, shape index: {}] }
   0x1   :  { %s2583_s5 = sld [smem:[%s3089_s0]]   ;;  %s2522_s14 = smov 3  }
   0x2   :  { %s2588_s9 = sld [smem:[%s3089_s0 + %s2520_s6]]   ;;  %s2523_s18 = smov 4  }
   0x3   :  { %s2593_s13 = sld [smem:[%s3089_s0 + %s2521_s10]]   ;;  %s2524_s22 = smov 5  }
   0x4   :  { %s2598_s17 = sld [smem:[%s3089_s0 + %s2522_s14]]   ;;  %s2525_s26 = smov 6  }
   0x5   :  { %s2603_s21 = sld [smem:[%s3089_s0 + %s2523_s18]]   ;;  %s2526_s30 = smov 7  }
   0x6   :  { %s2608_s25 = sld [smem:[%s3089_s0 + %s2524_s22]]   ;;  %s2527_s4 = smov 8  }
   0x7   :  { %s2613_s29 = sld [smem:[%s3089_s0 + %s2525_s26]]   ;;  %s2528_s10 = smov 9  }
   0x8   :  { %s2618_s3 = sld [smem:[%s3089_s0 + %s2526_s30]]   ;;  %s2529_s15 = smov 10  }
   0x9   :  { %s2623_s8 = sld [smem:[%s3089_s0 + %s2527_s4]]   ;;  %s2530_s20 = smov 11  }
   0xa   :  { %s2628_s14 = sld [smem:[%s3089_s0 + %s2528_s10]]   ;;  %s2531_s26 = smov 12  }
   0xb   :  { %s2633_s19 = sld [smem:[%s3089_s0 + %s2529_s15]]   ;;  %s2532_s1 = smov 13  }
   0xc   :  { %3096 = sst [smem:[#allocation48_spill]] %s2608_s25  ;;  %s2533_s7 = smov 14  }
   0xd   :  { %s2638_s24 = sld [smem:[%s3089_s0 + %s2530_s20]]   ;;  %s2534_s15 = smov 15  }
   0xe   :  { %s2643_s30 = sld [smem:[%s3089_s0 + %s2531_s26]]   ;;  %s2535_s22 = smov 16  }
   0xf   :  { %s2648_s6 = sld [smem:[%s3089_s0 + %s2532_s1]]   ;;  %s2536_s28 = smov 17  }
  0x10   :  { %3097 = sst [smem:[#allocation49_spill]] %s2628_s14 }
  0x11   :  { %s2653_s12 = sld [smem:[%s3089_s0 + %s2533_s7]]   ;;  %s2537_s7 = smov 18  }
  0x12   :  { %s2658_s20 = sld [smem:[%s3089_s0 + %s2534_s15]]   ;;  %s2538_s15 = smov 19  }
  0x13   :  { %3098 = sst [smem:[#allocation50_spill]] %s2638_s24 }
  0x14   :  { %s2663_s27 = sld [smem:[%s3089_s0 + %s2535_s22]]   ;;  %s2539_s22 = smov 20  }
  0x15   :  { %3099 = sst [smem:[#allocation51_spill]] %s2648_s6 }
  0x16   :  { %s2668_s4 = sld [smem:[%s3089_s0 + %s2536_s28]]   ;;  %s2540_s28 = smov 21  }
  0x17   :  { %s2673_s25 = sld [smem:[%s3089_s0 + %s2537_s7]]   ;;  %s2541_s7 = smov 22  }
  0x18   :  { %3100 = sst [smem:[#allocation52_spill]] %s2658_s20 }
  0x19   :  { %s2678_s20 = sld [smem:[%s3089_s0 + %s2538_s15]]   ;;  %s2542_s15 = smov 23  }
  0x1a   :  { %3101 = sst [smem:[#allocation53_spill]] %s2663_s27 }
  0x1b   :  { %s2683_s27 = sld [smem:[%s3089_s0 + %s2539_s22]]   ;;  %s2543_s22 = smov 24  }
  0x1c   :  { %s2688_s6 = sld [smem:[%s3089_s0 + %s2540_s28]]   ;;  %s2544_s28 = smov 25  }
  0x1d   :  { %3102 = sst [smem:[#allocation54_spill]] %s2673_s25 }
  0x1e   :  { %s2693_s25 = sld [smem:[%s3089_s0 + %s2541_s7]]   ;;  %s2545_s7 = smov 26  }
  0x1f   :  { %3103 = sst [smem:[#allocation55_spill]] %s2678_s20 }
  0x20   :  { %s2698_s20 = sld [smem:[%s3089_s0 + %s2542_s15]]   ;;  %s2546_s15 = smov 27  }
  0x21   :  { %3104 = sst [smem:[#allocation56_spill]] %s2683_s27 }
  0x22   :  { %s2703_s27 = sld [smem:[%s3089_s0 + %s2543_s22]]   ;;  %s2547_s22 = smov 28  }
  0x23   :  { %s2708_s24 = sld [smem:[%s3089_s0 + %s2544_s28]]   ;;  %s2548_s28 = smov 29  }
  0x24   :  { %3105 = sst [smem:[#allocation57_spill]] %s2693_s25 }
  0x25   :  { %s2713_s25 = sld [smem:[%s3089_s0 + %s2545_s7]]  }
  0x26   :  { %3106 = sst [smem:[#allocation58_spill]] %s2698_s20 }
  0x27   :  { %s2718_s20 = sld [smem:[%s3089_s0 + %s2546_s15]]  }
  0x28   :  { %3107 = sst [smem:[#allocation59_spill]] %s2703_s27 }
  0x29   :  { %s2723_s27 = sld [smem:[%s3089_s0 + %s2547_s22]]  }
  0x2a   :  { %s2728_s14 = sld [smem:[%s3089_s0 + %s2548_s28]]  }
  0x2b   :  { %64 = vsyncpa [#allocation3], 0 }
  0x2c   :  { %65 = vsyncpa [#allocation6], 0 }
  0x2d   :  { %66 = vsyncpa [#allocation9], 0 }
  0x2e   :  { %67 = vsyncpa [#allocation12], 0 }
  0x2f   :  { %68 = vsyncpa [#allocation15], 0 }
  0x30   :  { %69 = vsyncpa [#allocation18], 0 }
  0x31   :  { %70 = vsyncpa [#allocation21], 0 }
  0x32   :  { %71 = vsyncpa [#allocation24], 0 }
  0x33   :  { %72 = vsyncpa [#allocation27], 0 }
  0x34   :  { %73 = vsyncpa [#allocation30], 0 }
  0x35   :  { %74 = vsyncpa [#allocation33], 0 }
  0x36   :  { %75 = vsyncpa [#allocation4], 0  ;;  %s93_s7 = sshll.u32 %s2588_s9, 4  ;;  %s2549_s0 = smov [#allocation5]   ;;  %s94_s7 = int_to_ptr.hbm [resolvable:$true] %s93_s7 }
  0x37   :  { %s95_s10 = sshll.u32 %s2549_s0, 4  ;;  %s119_s11 = sshll.u32 %s2598_s17, 4  ;;  %s96_s10 = int_to_ptr.vmem [resolvable:$true] %s95_s10  ;;  %s120_s11 = int_to_ptr.hbm [resolvable:$true] %s119_s11 }
  0x38   :  { %s1968_s15 = sshra.s32 %s94_s7, 4  ;;  %s1972_s18 = scalar_lea.hbm %s2588_s9, 48  ;;  %s1969_s15 = int_to_ptr.hbm [resolvable:$true] %s1968_s15 }
  0x39   :  { %s1970_s16 = scalar_lea.hbm %s1969_s15, 48  ;;  %p1973_p1 = scmp.lt.s32.totalorder %s1969_s15, %s2588_s9 }
  0x3a   :  { %p1971_p0 = scmp.ne.s32.totalorder %s1969_s15, %s1970_s16  ;;  %p1974_p2 = scmp.lt.s32.totalorder %s1972_s18, %s1970_s16 }
  0x3c   :  { %p1975_p3 = por %p1974_p2, %p1973_p1 }
  0x3e   :  { %p1976_p4 = pnand %p1975_p3, %p1971_p0 }
  0x40   :  { %1979 = shalt.err (!%p1976_p4)
}
  0x41   :  { %s2550_s22 = smov 128   ;;  %s2551_s23 = smov 8  }
  0x42   :  { %101 = dma.hbm_to_vmem [thread:$0]  %s94_s7, 768, %s96_s10, [#allocation6], %s2550_s22, %s2550_s22, %s2551_s23  }
  0x43   :  { %s2552_s26 = smov [#allocation8]   ;;  %s148_s1 = sshll.u32 %s2613_s29, 4  ;;  %s149_s1 = int_to_ptr.hbm [resolvable:$true] %s148_s1 }
  0x44   :  { %s121_s28 = sshll.u32 %s2552_s26, 4  ;;  %s1992_s9 = sshra.s32 %s120_s11, 4  ;;  %s122_s28 = int_to_ptr.vmem [resolvable:$true] %s121_s28  ;;  %s1993_s9 = int_to_ptr.hbm [resolvable:$true] %s1992_s9 }
  0x45   :  { %s1994_s2 = scalar_lea.hbm %s1993_s9, 96  ;;  %s1996_s0 = scalar_lea.hbm %s2598_s17, 96 }
  0x46   :  { %p1995_p5 = scmp.ne.s32.totalorder %s1993_s9, %s1994_s2  ;;  %p1997_p6 = scmp.lt.s32.totalorder %s1993_s9, %s2598_s17 }
  0x47   :  { %p1998_p7 = scmp.lt.s32.totalorder %s1996_s0, %s1994_s2 }
  0x49   :  { %p1999_p8 = por %p1998_p7, %p1997_p6 }
  0x4b   :  { %p2000_p9 = pnand %p1999_p8, %p1995_p5 }
  0x4d   :  { %2003 = shalt.err (!%p2000_p9)
}
  0x4e   :  { %127 = dma.hbm_to_vmem [thread:$0]  %s120_s11, 1536, %s122_s28, [#allocation9], %s2550_s22, %s2550_s22, %s2551_s23  }
  0x4f   :  { %s171_s7 = sshll.u32 %s2623_s8, 4  ;;  %s2553_s10 = smov [#allocation11]   ;;  %s2744_s7 = int_to_ptr.hbm [resolvable:$true] %s171_s7 }
  0x50   :  { %s150_s15 = sshll.u32 %s2553_s10, 4  ;;  %s2016_s16 = sshra.s32 %s149_s1, 4  ;;  %s151_s15 = int_to_ptr.vmem [resolvable:$true] %s150_s15  ;;  %s2017_s16 = int_to_ptr.hbm [resolvable:$true] %s2016_s16 }
  0x51   :  { %s2018_s17 = scalar_lea.hbm %s2017_s16, 4  ;;  %s2020_s18 = scalar_lea.hbm %s2613_s29, 4 }
  0x52   :  { %p2019_p10 = scmp.ne.s32.totalorder %s2017_s16, %s2018_s17  ;;  %p2021_p11 = scmp.lt.s32.totalorder %s2017_s16, %s2613_s29 }
  0x53   :  { %p2022_p12 = scmp.lt.s32.totalorder %s2020_s18, %s2018_s17 }
  0x55   :  { %p2023_p13 = por %p2022_p12, %p2021_p11 }
  0x57   :  { %p2024_p0 = pnand %p2023_p13, %p2019_p10 }
  0x59   :  { %2027 = shalt.err (!%p2024_p0)
}
  0x5a   :  { %153 = dma.hbm_to_vmem [thread:$0]  %s149_s1, 64, %s151_s15, [#allocation12]  }
  0x5b   :  { %s2554_s11 = smov [#allocation14]   ;;  %s195_s28 = sshll.u32 %s2633_s19, 4  ;;  %s2749_s28 = int_to_ptr.hbm [resolvable:$true] %s195_s28 }
  0x5c   :  { %s173_s26 = sshll.u32 %s2554_s11, 4  ;;  %s2040_s9 = sshra.s32 %s2744_s7, 4  ;;  %s174_s26 = int_to_ptr.vmem [resolvable:$true] %s173_s26  ;;  %s2041_s9 = int_to_ptr.hbm [resolvable:$true] %s2040_s9 }
  0x5d   :  { %s2042_s2 = scalar_lea.hbm %s2041_s9, 96  ;;  %s2044_s29 = scalar_lea.hbm %s2623_s8, 96 }
  0x5e   :  { %p2043_p1 = scmp.ne.s32.totalorder %s2041_s9, %s2042_s2  ;;  %p2045_p2 = scmp.lt.s32.totalorder %s2041_s9, %s2623_s8 }
  0x5f   :  { %p2046_p3 = scmp.lt.s32.totalorder %s2044_s29, %s2042_s2 }
  0x61   :  { %p2047_p4 = por %p2046_p3, %p2045_p2 }
  0x63   :  { %p2048_p5 = pnand %p2047_p4, %p2043_p1 }
  0x65   :  { %2051 = shalt.err (!%p2048_p5)
}
  0x66   :  { %179 = dma.hbm_to_vmem [thread:$0]  %s2744_s7, 1536, %s174_s26, [#allocation15], %s2550_s22, %s2550_s22, %s2551_s23  }
  0x67   :  { %s2555_s1 = smov [#allocation17]   ;;  %s221_s10 = sshll.u32 %s2643_s30, 4  ;;  %s222_s10 = int_to_ptr.hbm [resolvable:$true] %s221_s10 }
  0x68   :  { %s197_s0 = sshll.u32 %s2555_s1, 4  ;;  %s2064_s15 = sshra.s32 %s2749_s28, 4  ;;  %s198_s0 = int_to_ptr.vmem [resolvable:$true] %s197_s0  ;;  %s2065_s15 = int_to_ptr.hbm [resolvable:$true] %s2064_s15 }
  0x69   :  { %s2066_s8 = scalar_lea.hbm %s2065_s15, 16  ;;  %s2068_s16 = scalar_lea.hbm %s2633_s19, 16 }
  0x6a   :  { %p2067_p6 = scmp.ne.s32.totalorder %s2065_s15, %s2066_s8  ;;  %p2069_p7 = scmp.lt.s32.totalorder %s2065_s15, %s2633_s19 }
  0x6b   :  { %p2070_p8 = scmp.lt.s32.totalorder %s2068_s16, %s2066_s8 }
  0x6d   :  { %p2071_p9 = por %p2070_p8, %p2069_p7 }
  0x6f   :  { %p2072_p10 = pnand %p2071_p9, %p2067_p6 }
  0x71   :  { %2075 = shalt.err (!%p2072_p10)
}
  0x72   :  { %203 = dma.hbm_to_vmem [thread:$0]  %s2749_s28, 256, %s198_s0, [#allocation18], %s2550_s22, %s2550_s22, %s2551_s23  }
  0x73   :  { %s2556_s7 = smov [#allocation20]   ;;  %s247_s18 = sshll.u32 %s2653_s12, 4  ;;  %s2767_s18 = int_to_ptr.hbm [resolvable:$true] %s247_s18 }
  0x74   :  { %s223_s17 = sshll.u32 %s2556_s7, 4  ;;  %s2088_s19 = sshra.s32 %s222_s10, 4  ;;  %s224_s17 = int_to_ptr.vmem [resolvable:$true] %s223_s17  ;;  %s2089_s19 = int_to_ptr.hbm [resolvable:$true] %s2088_s19 }
  0x75   :  { %s2090_s11 = scalar_lea.hbm %s2089_s19, 2  ;;  %s2092_s26 = scalar_lea.hbm %s2643_s30, 2 }
  0x76   :  { %p2091_p11 = scmp.ne.s32.totalorder %s2089_s19, %s2090_s11  ;;  %p2093_p12 = scmp.lt.s32.totalorder %s2089_s19, %s2643_s30 }
  0x77   :  { %p2094_p13 = scmp.lt.s32.totalorder %s2092_s26, %s2090_s11 }
  0x79   :  { %p2095_p0 = por %p2094_p13, %p2093_p12 }
  0x7b   :  { %p2096_p1 = pnand %p2095_p0, %p2091_p11 }
  0x7d   :  { %2099 = shalt.err (!%p2096_p1)
}
  0x7e   :  { %s2557_s9 = smov 16   ;;  %s2558_s28 = smov 1  }
  0x7f   :  { %229 = dma.hbm_to_vmem [thread:$0]  %s222_s10, 32, %s224_s17, [#allocation21], %s2557_s9, %s2557_s9, %s2558_s28  }
  0x80   :  { %s273_s2 = sshll.u32 %s2668_s4, 4  ;;  %s2559_s29 = smov [#allocation23]   ;;  %s2775_s2 = int_to_ptr.hbm [resolvable:$true] %s273_s2 }
  0x81   :  { %s249_s1 = sshll.u32 %s2559_s29, 4  ;;  %s2112_s30 = sshra.s32 %s2767_s18, 4  ;;  %s250_s1 = int_to_ptr.vmem [resolvable:$true] %s249_s1  ;;  %s2113_s30 = int_to_ptr.hbm [resolvable:$true] %s2112_s30 }
  0x82   :  { %s2114_s0 = scalar_lea.hbm %s2113_s30, 2  ;;  %s2116_s15 = scalar_lea.hbm %s2653_s12, 2 }
  0x83   :  { %p2115_p2 = scmp.ne.s32.totalorder %s2113_s30, %s2114_s0  ;;  %p2117_p3 = scmp.lt.s32.totalorder %s2113_s30, %s2653_s12 }
  0x84   :  { %p2118_p4 = scmp.lt.s32.totalorder %s2116_s15, %s2114_s0 }
  0x86   :  { %p2119_p5 = por %p2118_p4, %p2117_p3 }
  0x88   :  { %p2120_p6 = pnand %p2119_p5, %p2115_p2 }
  0x8a   :  { %2123 = shalt.err (!%p2120_p6)
}
  0x8b   :  { %255 = dma.hbm_to_vmem [thread:$0]  %s2767_s18, 32, %s250_s1, [#allocation24], %s2557_s9, %s2557_s9, %s2558_s28  }
  0x8c   :  { %s2560_s10 = smov [#allocation26]   ;;  %s303_s16 = sshll.u32 %s2688_s6, 4  ;;  %s2785_s16 = int_to_ptr.hbm [resolvable:$true] %s303_s16 }
  0x8d   :  { %s275_s8 = sshll.u32 %s2560_s10, 4  ;;  %s2136_s12 = sshra.s32 %s2775_s2, 4  ;;  %s276_s8 = int_to_ptr.vmem [resolvable:$true] %s275_s8  ;;  %s2137_s12 = int_to_ptr.hbm [resolvable:$true] %s2136_s12 }
  0x8e   :  { %s2138_s7 = scalar_lea.hbm %s2137_s12, 32  ;;  %s2140_s17 = scalar_lea.hbm %s2668_s4, 32 }
  0x8f   :  { %p2139_p7 = scmp.ne.s32.totalorder %s2137_s12, %s2138_s7  ;;  %p2141_p8 = scmp.lt.s32.totalorder %s2137_s12, %s2668_s4 }
  0x90   :  { %p2142_p9 = scmp.lt.s32.totalorder %s2140_s17, %s2138_s7 }
  0x92   :  { %p2143_p10 = por %p2142_p9, %p2141_p8 }
  0x94   :  { %p2144_p11 = pnand %p2143_p10, %p2139_p7 }
  0x96   :  { %2147 = shalt.err (!%p2144_p11)
}
  0x97   :  { %281 = dma.hbm_to_vmem [thread:$0]  %s2775_s2, 512, %s276_s8, [#allocation27], %s2550_s22, %s2550_s22, %s2551_s23  }
  0x98   :  { %s333_s18 = sshll.u32 %s2708_s24, 4  ;;  %s2561_s19 = smov [#allocation29]   ;;  %s2795_s18 = int_to_ptr.hbm [resolvable:$true] %s333_s18 }
  0x99   :  { %s305_s11 = sshll.u32 %s2561_s19, 4  ;;  %s2160_s4 = sshra.s32 %s2785_s16, 4  ;;  %s306_s11 = int_to_ptr.vmem [resolvable:$true] %s305_s11  ;;  %s2161_s4 = int_to_ptr.hbm [resolvable:$true] %s2160_s4 }
  0x9a   :  { %s2162_s26 = scalar_lea.hbm %s2161_s4, 32  ;;  %s2164_s29 = scalar_lea.hbm %s2688_s6, 32 }
  0x9b   :  { %p2163_p12 = scmp.ne.s32.totalorder %s2161_s4, %s2162_s26  ;;  %p2165_p13 = scmp.lt.s32.totalorder %s2161_s4, %s2688_s6 }
  0x9c   :  { %p2166_p0 = scmp.lt.s32.totalorder %s2164_s29, %s2162_s26 }
  0x9e   :  { %p2167_p1 = por %p2166_p0, %p2165_p13 }
  0xa0   :  { %p2168_p2 = pnand %p2167_p1, %p2163_p12 }
  0xa2   :  { %2171 = shalt.err (!%p2168_p2)
}
  0xa3   :  { %311 = dma.hbm_to_vmem [thread:$0]  %s2785_s16, 512, %s306_s11, [#allocation30], %s2550_s22, %s2550_s22, %s2551_s23  }
  0xa4   :  { %s2562_s2 = smov [#allocation32]   ;;  %s80_s30 = sshll.u32 %s2583_s5, 4  ;;  %s2805_s30 = int_to_ptr.hbm [resolvable:$true] %s80_s30 }
  0xa5   :  { %s335_s1 = sshll.u32 %s2562_s2, 4  ;;  %s2184_s6 = sshra.s32 %s2795_s18, 4  ;;  %s336_s1 = int_to_ptr.vmem [resolvable:$true] %s335_s1  ;;  %s2185_s6 = int_to_ptr.hbm [resolvable:$true] %s2184_s6 }
  0xa6   :  { %s2186_s0 = scalar_lea.hbm %s2185_s6, 96  ;;  %s2188_s15 = scalar_lea.hbm %s2708_s24, 96 }
  0xa7   :  { %p2187_p3 = scmp.ne.s32.totalorder %s2185_s6, %s2186_s0  ;;  %p2189_p4 = scmp.lt.s32.totalorder %s2185_s6, %s2708_s24 }
  0xa8   :  { %p2190_p5 = scmp.lt.s32.totalorder %s2188_s15, %s2186_s0 }
  0xaa   :  { %p2191_p6 = por %p2190_p5, %p2189_p4 }
  0xac   :  { %p2192_p7 = pnand %p2191_p6, %p2187_p3 }
  0xae   :  { %2195 = shalt.err (!%p2192_p7)
}
  0xaf   :  { %341 = dma.hbm_to_vmem [thread:$0]  %s2795_s18, 1536, %s336_s1, [#allocation33], %s2550_s22, %s2550_s22, %s2551_s23  }
  0xb0   :  { %s106_s10 = sshll.u32 %s2593_s13, 4  ;;  %s2563_s8 = smov [#allocation2]   ;;  %s2815_s10 = int_to_ptr.hbm [resolvable:$true] %s106_s10 }
  0xb1   :  { %s82_s16 = sshll.u32 %s2563_s8, 4  ;;  %s2208_s24 = sshra.s32 %s2805_s30, 4  ;;  %s83_s16 = int_to_ptr.vmem [resolvable:$true] %s82_s16  ;;  %s2209_s24 = int_to_ptr.hbm [resolvable:$true] %s2208_s24 }
  0xb2   :  { %s2210_s12 = scalar_lea.hbm %s2209_s24, 24  ;;  %s2212_s7 = scalar_lea.hbm %s2583_s5, 24 }
  0xb3   :  { %p2211_p8 = scmp.ne.s32.totalorder %s2209_s24, %s2210_s12  ;;  %p2213_p9 = scmp.lt.s32.totalorder %s2209_s24, %s2583_s5 }
  0xb4   :  { %p2214_p10 = scmp.lt.s32.totalorder %s2212_s7, %s2210_s12 }
  0xb6   :  { %p2215_p11 = por %p2214_p10, %p2213_p9 }
  0xb8   :  { %p2216_p12 = pnand %p2215_p11, %p2211_p8 }
  0xba   :  { %2219 = shalt.err (!%p2216_p12)
}
  0xbb   :  { %88 = dma.hbm_to_vmem [thread:$0]  %s2805_s30, 384, %s83_s16, [#allocation3], %s2550_s22, %s2550_s22, %s2551_s23  }
  0xbc   :  { %s2564_s17 = smov [#allocation7]   ;;  %s132_s19 = sshll.u32 %s2603_s21, 4  ;;  %s2825_s19 = int_to_ptr.hbm [resolvable:$true] %s132_s19 }
  0xbd   :  { %s108_s18 = sshll.u32 %s2564_s17, 4  ;;  %s2232_s5 = sshra.s32 %s2815_s10, 4  ;;  %s109_s18 = int_to_ptr.vmem [resolvable:$true] %s108_s18  ;;  %s2233_s5 = int_to_ptr.hbm [resolvable:$true] %s2232_s5 }
  0xbe   :  { %s2234_s11 = scalar_lea.hbm %s2233_s5, 3  ;;  %s2236_s4 = scalar_lea.hbm %s2593_s13, 3 }
  0xbf   :  { %p2235_p13 = scmp.ne.s32.totalorder %s2233_s5, %s2234_s11  ;;  %p2237_p0 = scmp.lt.s32.totalorder %s2233_s5, %s2593_s13 }
  0xc0   :  { %p2238_p1 = scmp.lt.s32.totalorder %s2236_s4, %s2234_s11 }
  0xc2   :  { %p2239_p2 = por %p2238_p1, %p2237_p0 }
  0xc4   :  { %p2240_p3 = pnand %p2239_p2, %p2235_p13 }
  0xc6   :  { %2243 = shalt.err (!%p2240_p3)
}
  0xc7   :  { %114 = dma.hbm_to_vmem [thread:$0]  %s2815_s10, 48, %s109_s18, [#allocation6], %s2557_s9, %s2557_s9, %s2558_s28  }
  0xc8   :  { %s158_s26 = sshll.u32 %s2618_s3, 4  ;;  %s2565_s29 = smov [#allocation10]   ;;  %s2835_s26 = int_to_ptr.hbm [resolvable:$true] %s158_s26 }
  0xc9   :  { %s134_s2 = sshll.u32 %s2565_s29, 4  ;;  %s2256_s13 = sshra.s32 %s2825_s19, 4  ;;  %s135_s2 = int_to_ptr.vmem [resolvable:$true] %s134_s2  ;;  %s2257_s13 = int_to_ptr.hbm [resolvable:$true] %s2256_s13 }
  0xca   :  { %s2258_s1 = scalar_lea.hbm %s2257_s13, 3  ;;  %s2260_s30 = scalar_lea.hbm %s2603_s21, 3 }
  0xcb   :  { %p2259_p4 = scmp.ne.s32.totalorder %s2257_s13, %s2258_s1  ;;  %p2261_p5 = scmp.lt.s32.totalorder %s2257_s13, %s2603_s21 }
  0xcc   :  { %p2262_p6 = scmp.lt.s32.totalorder %s2260_s30, %s2258_s1 }
  0xce   :  { %p2263_p7 = por %p2262_p6, %p2261_p5 }
  0xd0   :  { %p2264_p8 = pnand %p2263_p7, %p2259_p4 }
  0xd2   :  { %2267 = shalt.err (!%p2264_p8)
}
  0xd3   :  { %s3108_s6 = sld [smem:[#allocation49_spill]]  ;;  %s2566_s0 = smov [#allocation13]  }
  0xd4   :  { %140 = dma.hbm_to_vmem [thread:$0]  %s2825_s19, 48, %s135_s2, [#allocation9], %s2557_s9, %s2557_s9, %s2558_s28  }
  0xd5   :  { %s160_s15 = sshll.u32 %s2566_s0, 4  ;;  %s2280_s8 = sshra.s32 %s2835_s26, 4  ;;  %s161_s15 = int_to_ptr.vmem [resolvable:$true] %s160_s15  ;;  %s2281_s8 = int_to_ptr.hbm [resolvable:$true] %s2280_s8 }
  0xd6   :  { %s2282_s21 = scalar_lea.hbm %s2281_s8, 32  ;;  %s2284_s16 = scalar_lea.hbm %s2618_s3, 32 }
  0xd7   :  { %p2283_p9 = scmp.ne.s32.totalorder %s2281_s8, %s2282_s21  ;;  %p2285_p10 = scmp.lt.s32.totalorder %s2281_s8, %s2618_s3 }
  0xd8   :  { %p2286_p11 = scmp.lt.s32.totalorder %s2284_s16, %s2282_s21 }
  0xd9   :  { %s185_s10 = sshll.u32 %s3108_s6, 4  ;;  %s186_s10 = int_to_ptr.hbm [resolvable:$true] %s185_s10 }
  0xda   :  { %p2287_p12 = por %p2286_p11, %p2285_p10 }
  0xdc   :  { %p2288_p13 = pnand %p2287_p12, %p2283_p9 }
  0xde   :  { %2291 = shalt.err (!%p2288_p13)
}
  0xdf   :  { %s3109_s9 = sld [smem:[#allocation50_spill]]  ;;  %s2567_s24 = smov [#allocation16]  }
  0xe0   :  { %166 = dma.hbm_to_vmem [thread:$0]  %s2835_s26, 512, %s161_s15, [#allocation12], %s2550_s22, %s2550_s22, %s2551_s23  }
  0xe1   :  { %s187_s12 = sshll.u32 %s2567_s24, 4  ;;  %s2304_s7 = sshra.s32 %s186_s10, 4  ;;  %s188_s12 = int_to_ptr.vmem [resolvable:$true] %s187_s12  ;;  %s2305_s7 = int_to_ptr.hbm [resolvable:$true] %s2304_s7 }
  0xe2   :  { %s2306_s3 = scalar_lea.hbm %s2305_s7, 1  ;;  %s2308_s17 = scalar_lea.hbm %s3108_s6, 1 }
  0xe3   :  { %p2307_p0 = scmp.ne.s32.totalorder %s2305_s7, %s2306_s3  ;;  %p2309_p1 = scmp.lt.s32.totalorder %s2305_s7, %s3108_s6 }
  0xe4   :  { %p2310_p2 = scmp.lt.s32.totalorder %s2308_s17, %s2306_s3 }
  0xe5   :  { %s208_s28 = sshll.u32 %s3109_s9, 4  ;;  %s2853_s28 = int_to_ptr.hbm [resolvable:$true] %s208_s28 }
  0xe6   :  { %p2311_p3 = por %p2310_p2, %p2309_p1 }
  0xe8   :  { %p2312_p4 = pnand %p2311_p3, %p2307_p0 }
  0xea   :  { %2315 = shalt.err (!%p2312_p4)
}
  0xeb   :  { %190 = dma.hbm_to_vmem [thread:$0]  %s186_s10, 16, %s188_s12, [#allocation15]  }
  0xec   :  { %s3110_s18 = sld [smem:[#allocation51_spill]]  ;;  %s2568_s19 = smov [#allocation19]  }
  0xed   :  { %s210_s5 = sshll.u32 %s2568_s19, 4  ;;  %s2328_s4 = sshra.s32 %s2853_s28, 4  ;;  %s211_s5 = int_to_ptr.vmem [resolvable:$true] %s210_s5  ;;  %s2329_s4 = int_to_ptr.hbm [resolvable:$true] %s2328_s4 }
  0xee   :  { %s2330_s26 = scalar_lea.hbm %s2329_s4, 32  ;;  %s2332_s29 = scalar_lea.hbm %s3109_s9, 32 }
  0xef   :  { %p2331_p5 = scmp.ne.s32.totalorder %s2329_s4, %s2330_s26  ;;  %p2333_p6 = scmp.lt.s32.totalorder %s2329_s4, %s3109_s9 }
  0xf0   :  { %p2334_p7 = scmp.lt.s32.totalorder %s2332_s29, %s2330_s26 }
  0xf2   :  { %s234_s11 = sshll.u32 %s3110_s18, 4  ;;  %p2335_p8 = por %p2334_p7, %p2333_p6  ;;  %s2858_s11 = int_to_ptr.hbm [resolvable:$true] %s234_s11 }
  0xf4   :  { %p2336_p9 = pnand %p2335_p8, %p2331_p5 }
  0xf6   :  { %2339 = shalt.err (!%p2336_p9)
}
  0xf7   :  { %s3111_s2 = sld [smem:[#allocation53_spill]]  ;;  %s2569_s1 = smov [#allocation22]  }
  0xf8   :  { %216 = dma.hbm_to_vmem [thread:$0]  %s2853_s28, 512, %s211_s5, [#allocation18], %s2550_s22, %s2550_s22, %s2551_s23  }
  0xf9   :  { %s236_s30 = sshll.u32 %s2569_s1, 4  ;;  %s2352_s6 = sshra.s32 %s2858_s11, 4  ;;  %s237_s30 = int_to_ptr.vmem [resolvable:$true] %s236_s30  ;;  %s2353_s6 = int_to_ptr.hbm [resolvable:$true] %s2352_s6 }
  0xfa   :  { %s2354_s0 = scalar_lea.hbm %s2353_s6, 64  ;;  %s2356_s15 = scalar_lea.hbm %s3110_s18, 64 }
  0xfb   :  { %p2355_p10 = scmp.ne.s32.totalorder %s2353_s6, %s2354_s0  ;;  %p2357_p11 = scmp.lt.s32.totalorder %s2353_s6, %s3110_s18 }
  0xfc   :  { %p2358_p12 = scmp.lt.s32.totalorder %s2356_s15, %s2354_s0 }
  0xfd   :  { %s263_s13 = sshll.u32 %s3111_s2, 4  ;;  %s264_s13 = int_to_ptr.hbm [resolvable:$true] %s263_s13 }
  0xfe   :  { %p2359_p13 = por %p2358_p12, %p2357_p11 }
 0x100   :  { %p2360_p0 = pnand %p2359_p13, %p2355_p10 }
 0x102   :  { %2363 = shalt.err (!%p2360_p0)
}
 0x103   :  { %s3112_s10 = sld [smem:[#allocation54_spill]]  ;;  %s2570_s8 = smov [#allocation25]  }
 0x104   :  { %242 = dma.hbm_to_vmem [thread:$0]  %s2858_s11, 1024, %s237_s30, [#allocation21], %s2550_s22, %s2550_s22, %s2551_s23  }
 0x105   :  { %s265_s21 = sshll.u32 %s2570_s8, 4  ;;  %s2376_s9 = sshra.s32 %s264_s13, 4  ;;  %s266_s21 = int_to_ptr.vmem [resolvable:$true] %s265_s21  ;;  %s2377_s9 = int_to_ptr.hbm [resolvable:$true] %s2376_s9 }
 0x106   :  { %s2378_s28 = scalar_lea.hbm %s2377_s9, 4  ;;  %s2380_s24 = scalar_lea.hbm %s3111_s2, 4 }
 0x107   :  { %p2379_p1 = scmp.ne.s32.totalorder %s2377_s9, %s2378_s28  ;;  %p2381_p2 = scmp.lt.s32.totalorder %s2377_s9, %s3111_s2 }
 0x108   :  { %p2382_p3 = scmp.lt.s32.totalorder %s2380_s24, %s2378_s28 }
 0x109   :  { %s286_s16 = sshll.u32 %s3112_s10, 4  ;;  %s2876_s16 = int_to_ptr.hbm [resolvable:$true] %s286_s16 }
 0x10a   :  { %p2383_p4 = por %p2382_p3, %p2381_p2 }
 0x10c   :  { %p2384_p5 = pnand %p2383_p4, %p2379_p1 }
 0x10e   :  { %2387 = shalt.err (!%p2384_p5)
}
 0x10f   :  { %268 = dma.hbm_to_vmem [thread:$0]  %s264_s13, 64, %s266_s21, [#allocation24]  }
 0x110   :  { %s3113_s12 = sld [smem:[#allocation58_spill]]  ;;  %s2571_s3 = smov [#allocation28]  }
 0x111   :  { %s288_s17 = sshll.u32 %s2571_s3, 4  ;;  %s2400_s18 = sshra.s32 %s2876_s16, 4  ;;  %s289_s17 = int_to_ptr.vmem [resolvable:$true] %s288_s17  ;;  %s2401_s18 = int_to_ptr.hbm [resolvable:$true] %s2400_s18 }
 0x112   :  { %s2402_s19 = scalar_lea.hbm %s2401_s18, 64  ;;  %s2404_s5 = scalar_lea.hbm %s3112_s10, 64 }
 0x113   :  { %p2403_p6 = scmp.ne.s32.totalorder %s2401_s18, %s2402_s19  ;;  %p2405_p7 = scmp.lt.s32.totalorder %s2401_s18, %s3112_s10 }
 0x114   :  { %p2406_p8 = scmp.lt.s32.totalorder %s2404_s5, %s2402_s19 }
 0x116   :  { %s318_s7 = sshll.u32 %s3113_s12, 4  ;;  %p2407_p9 = por %p2406_p8, %p2405_p7  ;;  %s2881_s7 = int_to_ptr.hbm [resolvable:$true] %s318_s7 }
 0x118   :  { %p2408_p10 = pnand %p2407_p9, %p2403_p6 }
 0x11a   :  { %2411 = shalt.err (!%p2408_p10)
}
 0x11b   :  { %294 = dma.hbm_to_vmem [thread:$0]  %s2876_s16, 1024, %s289_s17, [#allocation27], %s2550_s22, %s2550_s22, %s2551_s23  }
 0x11c   :  { %s2572_s11 = smov [#allocation31]   ;;  %s348_s26 = sshll.u32 %s2718_s20, 4  ;;  %s349_s26 = int_to_ptr.hbm [resolvable:$true] %s348_s26 }
 0x11d   :  { %s320_s4 = sshll.u32 %s2572_s11, 4  ;;  %s2424_s29 = sshra.s32 %s2881_s7, 4  ;;  %s321_s4 = int_to_ptr.vmem [resolvable:$true] %s320_s4  ;;  %s2425_s29 = int_to_ptr.hbm [resolvable:$true] %s2424_s29 }
 0x11e   :  { %s2426_s2 = scalar_lea.hbm %s2425_s29, 32  ;;  %s2428_s13 = scalar_lea.hbm %s3113_s12, 32 }
 0x11f   :  { %p2427_p11 = scmp.ne.s32.totalorder %s2425_s29, %s2426_s2  ;;  %p2429_p12 = scmp.lt.s32.totalorder %s2425_s29, %s3113_s12 }
 0x120   :  { %p2430_p13 = scmp.lt.s32.totalorder %s2428_s13, %s2426_s2 }
 0x122   :  { %p2431_p0 = por %p2430_p13, %p2429_p12 }
 0x124   :  { %p2432_p1 = pnand %p2431_p0, %p2427_p11 }
 0x126   :  { %2435 = shalt.err (!%p2432_p1)
}
 0x127   :  { %326 = dma.hbm_to_vmem [thread:$0]  %s2881_s7, 512, %s321_s4, [#allocation30], %s2550_s22, %s2550_s22, %s2551_s23  }
 0x128   :  { %s2573_s1 = smov [#allocation34]   ;;  %s2448_s6 = sshra.s32 %s349_s26, 4  ;;  %s2449_s6 = int_to_ptr.hbm [resolvable:$true] %s2448_s6 }
 0x129   :  { %s350_s30 = sshll.u32 %s2573_s1, 4  ;;  %s2450_s0 = scalar_lea.hbm %s2449_s6, 32  ;;  %s351_s30 = int_to_ptr.vmem [resolvable:$true] %s350_s30 }
 0x12a   :  { %p2451_p2 = scmp.ne.s32.totalorder %s2449_s6, %s2450_s0  ;;  %s2452_s15 = scalar_lea.hbm %s2718_s20, 32 }
 0x12b   :  { %p2453_p3 = scmp.lt.s32.totalorder %s2449_s6, %s2718_s20  ;;  %p2454_p4 = scmp.lt.s32.totalorder %s2452_s15, %s2450_s0 }
 0x12d   :  { %p2455_p5 = por %p2454_p4, %p2453_p3 }
 0x12f   :  { %p2456_p6 = pnand %p2455_p5, %p2451_p2 }
 0x131   :  { %2459 = shalt.err (!%p2456_p6)
}
 0x132   :  { %356 = dma.hbm_to_vmem [thread:$0]  %s349_s26, 512, %s351_s30, [#allocation33], %s2550_s22, %s2550_s22, %s2551_s23  }
 0x133   :  { %2496 = dma.done.wait [#allocation3], 384  }
 0x134   :  { %2497 = vsyncadd [#allocation3], 4294966912 }
 0x135   :  { %2498 = dma.done.wait [#allocation6], 816  }
 0x136   :  { %2499 = vsyncadd [#allocation6], 4294966480 }
 0x137   :  { %2500 = dma.done.wait [#allocation9], 1584  }
 0x138   :  { %2501 = vsyncadd [#allocation9], 4294965712 }
 0x139   :  { %2502 = dma.done.wait [#allocation12], 576  }
 0x13a   :  { %2503 = vsyncadd [#allocation12], 4294966720 }
 0x13b   :  { %2504 = dma.done.wait [#allocation15], 1552  }
 0x13c   :  { %2505 = vsyncadd [#allocation15], 4294965744 }
 0x13d   :  { %2506 = dma.done.wait [#allocation18], 768  }
 0x13e   :  { %2507 = vsyncadd [#allocation18], 4294966528 }
 0x13f   :  { %2508 = dma.done.wait [#allocation21], 1056  }
 0x140   :  { %2509 = vsyncadd [#allocation21], 4294966240 }
 0x141   :  { %2510 = dma.done.wait [#allocation24], 96  }
 0x142   :  { %2511 = vsyncadd [#allocation24], 4294967200 }
 0x143   :  { %2512 = dma.done.wait [#allocation27], 1536  }
 0x144   :  { %2513 = vsyncadd [#allocation27], 4294965760 }
 0x145   :  { %2514 = dma.done.wait [#allocation30], 1024  }
 0x146   :  { %2515 = vsyncadd [#allocation30], 4294966272 }
 0x147   :  { %2516 = dma.done.wait [#allocation33], 2048  }
 0x148   :  { %2517 = vsyncadd [#allocation33], 4294965248  ;;  %v521_v0 = vld [vmem:[#allocation5 + $0x8] sm:$0xff]  ;;  %v520_v1 = vld [vmem:[#allocation5] sm:$0xff]  ;;  %vm526_vm0 = vcmask 130048   ;;  %s3114_s20 = sld [smem:[#allocation56_spill]] }
 0x149   :  { %v519_v2 = vld [vmem:[#allocation2] sm:$0xff]  ;;  %544 = vmatpush.msra.mxu2 %v521_v0  ;;  %v445_v6 = vld [vmem:[#allocation29 + $0x8] sm:$0xff]  ;;  %v444_v8 = vld [vmem:[#allocation29] sm:$0xff]  ;;  %vm452_vm1 = vcmask 261120   ;;  %s3115_s22 = sld [smem:[#allocation48_spill]]  ;;  %vm939_vm7 = vcmask 31744  }
 0x14a   :  { %v447_v3 = vld [vmem:[#allocation29 + $0x18] sm:$0xff]  ;;  %v446_v4 = vld [vmem:[#allocation29 + $0x10] sm:$0xff]  ;;  %v554_v9 = vld [vmem:[#allocation8 + $0x8] sm:$0xff]  ;;  %s3116_s23 = sld [smem:[#allocation57_spill]]  ;;  %s2574_s16 = smov [#allocation35]  }
 0x14b   :  { %v556_v5 = vld [vmem:[#allocation8 + $0x18] sm:$0xff]  ;;  %468 = vmatpush.msra.mxu0 %v447_v3  ;;  %545 = vmatpush.msra.mxu2 %v520_v1  ;;  %v555_v7 = vld [vmem:[#allocation8 + $0x10] sm:$0xff]  ;;  %v553_v11 = vld [vmem:[#allocation8] sm:$0xff]  ;;  %s3117_s10 = sld [smem:[#allocation52_spill]]  ;;  %s1744_s9 = sshll.u32 %s2574_s16, 4  ;;  %s1745_s9 = int_to_ptr.vmem [resolvable:$true] %s1744_s9 }
 0x14c   :  { %576 = vmatpush.msra.mxu3 %v556_v5  ;;  %1797 = vmatmul.msk.f32.vlgmr.msra.gmra.mxu2 %vm526_vm0, %v519_v2  ;;  %v672_v12 = vld [vmem:[#allocation5 + $0x18] sm:$0xff]  ;;  %v671_v13 = vld [vmem:[#allocation5 + $0x10] sm:$0xff]  ;;  %v481_v15 = vld [vmem:[#allocation31 + $0x10] sm:$0xff]  ;;  %s3118_s8 = sld [smem:[#allocation59_spill]]  ;;  %s1746_s28 = sshll.u32 %s2728_s14, 4  ;;  %s1747_s28 = int_to_ptr.hbm [resolvable:$true] %s1746_s28 }
 0x14d   :  { %469 = vmatpush.msra.mxu0 %v446_v4  ;;  %v482_v14 = vld [vmem:[#allocation31 + $0x18] sm:$0xff]  ;;  %v480_v16 = vld [vmem:[#allocation31 + $0x8] sm:$0xff]  ;;  %v479_v17 = vld [vmem:[#allocation31] sm:$0xff]  ;;  %s3119_s21 = sld [smem:[#allocation55_spill]]  ;;  %s2488_s12 = scalar_lea.hbm %s2728_s14, 8 }
 0x14e   :  { %577 = vmatpush.msra.mxu3 %v555_v7  ;;  %v443_v10 = vld [vmem:[%s3114_s20] sm:$0xff]  ;;  %502 = vmatpush.msra.mxu1 %v482_v14  ;;  %v2906_v18 = vld [vmem:[#allocation13 + $0x18] sm:$0xff]  ;;  %v1916_v19 = vld [vmem:[#allocation7] ss:$0 sm:$0xff] }
 0x14f   :  { %470 = vmatpush.msra.mxu0 %v445_v6  ;;  %v669_v24 = vld [vmem:[#allocation2 + $0x8] sm:$0xff]  ;;  %v513_v26 = vld [vmem:[%s3115_s22] sm:$0xf]  ;;  %v514_v33 = vld [vmem:[#allocation11] sm:$0xf] }
 0x150   :  { %578 = vmatpush.msra.mxu3 %v554_v9  ;;  %503 = vmatpush.msra.mxu1 %v481_v15  ;;  %v2912_v25 = vld [vmem:[#allocation13 + $0x10] sm:$0xff]  ;;  %v2917_v27 = vld [vmem:[#allocation13 + $0x8] sm:$0xff]  ;;  %v2924_v34 = vld [vmem:[#allocation13] sm:$0xff] }
 0x151   :  { %471 = vmatpush.msra.mxu0 %v444_v8  ;;  %1799 = vmatpush.xpose.msk.msrb.mxu2 %vm452_vm1, %v513_v26  ;;  %v1917_v28 = vld [vmem:[%s3116_s23] ss:$0 sm:$0xff]  ;;  %v708_v35 = vld [vmem:[#allocation8 + $0x38] sm:$0xff]  ;;  %v706_v37 = vld [vmem:[#allocation8 + $0x28] sm:$0xff] }
 0x152   :  { %1795 = vmatmul.msk.f32.vlgmr.msra.gmra.mxu0 %vm452_vm1, %v443_v10  ;;  %579 = vmatpush.msra.mxu3 %v553_v11  ;;  %v707_v36 = vld [vmem:[#allocation8 + $0x30] sm:$0xff]  ;;  %v705_v38 = vld [vmem:[#allocation8 + $0x20] sm:$0xff]  ;;  %v1919_v44 = vld [vmem:[#allocation7 + $0x1] ss:$0 sm:$0xff] }
 0x153   :  { %504 = vmatpush.msra.mxu1 %v480_v16  ;;  %1801 = vmatpush.xpose.msk.msrb.mxu0 %vm452_vm1, %v514_v33  ;;  %v1918_v39 = vld [vmem:[#allocation10] ss:$0 sm:$0xff]  ;;  %v807_v49 = vld [vmem:[#allocation5 + $0x28] sm:$0xff]  ;;  %v806_v50 = vld [vmem:[#allocation5 + $0x20] sm:$0xff] }
 0x154   :  { %695 = vmatpush.msrb.mxu3 %v672_v12  ;;  %v1921_v52 = vld [vmem:[#allocation10 + $0x1] ss:$0 sm:$0xff]  ;;  %v804_v57 = vld [vmem:[#allocation2 + $0x10] sm:$0xff]  ;;  %v843_v58 = vld [vmem:[#allocation8 + $0x58] sm:$0xff] }
 0x155   :  { %505 = vmatpush.msra.mxu1 %v479_v17  ;;  %729 = vmatpush.msra.mxu2 %v708_v35  ;;  %v842_v59 = vld [vmem:[#allocation8 + $0x50] sm:$0xff]  ;;  %v841_v60 = vld [vmem:[#allocation8 + $0x48] sm:$0xff]  ;;  %v840_v61 = vld [vmem:[#allocation8 + $0x40] sm:$0xff] }
 0x156   :  { %696 = vmatpush.msrb.mxu3 %v671_v13  ;;  %v1922_v2 = vld [vmem:[#allocation7 + $0x2] ss:$0 sm:$0xff]  ;;  %v1923_v14 = vld [vmem:[#allocation10 + $0x2] ss:$0 sm:$0xff] }
 0x157   :  { %1803 = vmatpush.xpose.msk.msrb.mxu1 %vm452_vm1, %v2906_v18  ;;  %1810 = vmatpush.xpose.msk.msra.mxu0 %vm452_vm1, %v513_v26 }
 0x158   :  { %730 = vmatpush.msra.mxu2 %v707_v36 }
 0x15a   :  { %731 = vmatpush.msra.mxu2 %v706_v37 }
 0x15b   :  { %1804 = vmatpush.xpose.msk.msrb.mxu1 %vm452_vm1, %v2912_v25 }
 0x15c   :  { %732 = vmatpush.msra.mxu2 %v705_v38 }
 0x15f   :  { %1805 = vmatpush.xpose.msk.msrb.mxu1 %vm452_vm1, %v2917_v27 }
 0x163   :  { %1806 = vmatpush.xpose.msk.msrb.mxu1 %vm452_vm1, %v2924_v34 }
 0x1cf   :  { %v547_v20 = vpop.f32.mrf.mxu2  ;;  %v473_v29 = vpop.f32.mrf.mxu0 }
 0x1d0   :  { %v548_v21 = vadd.f32 %v1916_v19, %v547_v20  ;;  %v474_v30 = vadd.f32 %v1917_v28, %v473_v29 }
 0x1d2   :  { %v551_v22 = vmul.f32 0.25, %v548_v21  ;;  %vm550_vm2 = vcmp.gt.f32.partialorder %v548_v21, 0.0  ;;  %v477_v31 = vmul.f32 0.25, %v474_v30  ;;  %vm476_vm3 = vcmp.gt.f32.partialorder %v474_v30, 0.0 }
 0x1d4   :  { %v552_v23 = vsel %vm550_vm2, %v548_v21, %v551_v22  ;;  %v478_v32 = vsel %vm476_vm3, %v474_v30, %v477_v31 }
 0x1d5   :  { %1798 = vmatmul.msk.f32.vlgmr.msra.gmra.mxu3 %vm452_vm1, %v552_v23  ;;  %1796 = vmatmul.msk.f32.vlgmr.msra.gmra.mxu1 %vm452_vm1, %v478_v32 }
 0x1d6   :  { %1812 = vmatpush.xpose.msk.msra.mxu3 %vm452_vm1, %v514_v33  ;;  %864 = vmatpush.msra.mxu1 %v843_v58 }
 0x1d8   :  { %865 = vmatpush.msra.mxu1 %v842_v59 }
 0x1da   :  { %866 = vmatpush.msra.mxu1 %v841_v60 }
 0x1dc   :  { %867 = vmatpush.msra.mxu1 %v840_v61 }
 0x1dd   :  { %1808 = vmatmul.msk.f32.vlgmr.msrb.gmra.mxu3 %vm526_vm0, %v669_v24 }
 0x1de   :  { %1821 = vmatpush.xpose.msk.msrb.mxu3 %vm452_vm1, %v513_v26 }
 0x252   :  { %v2974_v12 = vpop.f32.mrf.mxu1 }
 0x258   :  { %v581_v40 = vpop.f32.mrf.mxu3 }
 0x259   :  { %v582_v41 = vadd.f32 %v1918_v39, %v581_v40 }
 0x25b   :  { %vm584_vm4 = vcmp.gt.f32.partialorder %v582_v41, 0.0  ;;  %v585_v42 = vmul.f32 0.25, %v582_v41 }
 0x25d   :  { %v2932_v43 = vsel %vm584_vm4, %v582_v41, %v585_v42 }
 0x25e   :  { %1800 = vmatmul.msk.f32.vlgmr.msrb.gmra.mxu2 %vm452_vm1, %v2932_v43  ;;  %1802 = vmatmul.msk.f32.vlgmr.msrb.gmra.mxu0 %vm452_vm1, %v2932_v43 }
 0x25f   :  { %1807 = vmatmul.msk.f32.vlgmr.msrb.gmra.mxu1 %vm452_vm1, %v2932_v43  ;;  %1814 = vmatpush.xpose.msk.msrb.mxu2 %vm452_vm1, %v2906_v18 }
 0x260   :  { %v698_v45 = vpop.f32.mrf.mxu3  ;;  %830 = vmatpush.msrb.mxu0 %v807_v49  ;;  %1825 = vmatpush.xpose.msk.msrb.mxu1 %vm452_vm1, %v2906_v18 }
 0x261   :  { %v699_v46 = vadd.f32 %v1919_v44, %v698_v45 }
 0x262   :  { %831 = vmatpush.msrb.mxu0 %v806_v50  ;;  %v1059_v50 = vld [vmem:[#allocation14 + $0x38] sm:$0xff] }
 0x263   :  { %vm701_vm5 = vcmp.gt.f32.partialorder %v699_v46, 0.0  ;;  %v702_v47 = vmul.f32 0.25, %v699_v46  ;;  %1815 = vmatpush.xpose.msk.msrb.mxu2 %vm452_vm1, %v2912_v25 }
 0x264   :  { %1826 = vmatpush.xpose.msk.msrb.mxu1 %vm452_vm1, %v2912_v25 }
 0x265   :  { %v703_v48 = vsel %vm701_vm5, %v699_v46, %v702_v47 }
 0x266   :  { %1809 = vmatmul.msk.f32.vlgmr.msra.gmra.mxu2 %vm452_vm1, %v703_v48 }
 0x267   :  { %1816 = vmatpush.xpose.msk.msrb.mxu2 %vm452_vm1, %v2917_v27 }
 0x268   :  { %1827 = vmatpush.xpose.msk.msrb.mxu1 %vm452_vm1, %v2917_v27 }
 0x26b   :  { %1817 = vmatpush.xpose.msk.msrb.mxu2 %vm452_vm1, %v2924_v34 }
 0x26c   :  { %1828 = vmatpush.xpose.msk.msrb.mxu1 %vm452_vm1, %v2924_v34 }
 0x2db   :  { %v633_v62 = vpop.f32.mrf.mxu0 }
 0x2dc   :  { %v2976_v13 = vpop.f32.mrf.mxu1 }
 0x2e1   :  { %v2949_v51 = vpop.f32.mrf.mxu2 }
 0x2e2   :  { %v938_v27 = vmul.f32 %v633_v62, %v2949_v51 }
 0x2e4   :  { %v940_v29 = vsel %vm939_vm7, %v938_v27, 0.0 }
 0x2e9   :  { %v734_v53 = vpop.f32.mrf.mxu2 }
 0x2ea   :  { %v735_v54 = vadd.f32 %v1921_v52, %v734_v53 }
 0x2ec   :  { %vm737_vm6 = vcmp.gt.f32.partialorder %v735_v54, 0.0  ;;  %v738_v55 = vmul.f32 0.25, %v735_v54 }
 0x2ee   :  { %v2951_v56 = vsel %vm737_vm6, %v735_v54, %v738_v55  ;;  %v1058_v55 = vld [vmem:[#allocation14 + $0x30] sm:$0xff] }
 0x2ef   :  { %1811 = vmatmul.msk.f32.vlgmr.msra.gmra.mxu0 %vm452_vm1, %v2951_v56  ;;  %1813 = vmatmul.msk.f32.vlgmr.msra.gmra.mxu3 %vm452_vm1, %v2951_v56 }
 0x2f0   :  { %1818 = vmatmul.msk.f32.vlgmr.msrb.gmra.mxu2 %vm452_vm1, %v2951_v56  ;;  %1823 = vmatpush.xpose.msk.msra.mxu0 %vm452_vm1, %v514_v33 }
 0x2f1   :  { %1075 = vmatpush.msra.mxu3 %v1059_v50 }
 0x2f3   :  { %1076 = vmatpush.msra.mxu3 %v1058_v55 }
 0x2f7   :  { %1819 = vmatmul.msk.f32.vlgmr.msrb.gmra.mxu0 %vm526_vm0, %v804_v57 }
 0x36c   :  { %v760_v63 = vpop.f32.mrf.mxu0 }
 0x36d   :  { %v951_v0 = vmul.f32 %v760_v63, %v633_v62 }
 0x36f   :  { %v952_v1 = vsel %vm939_vm7, %v951_v0, 0.0 }
 0x370   :  { %953 = vadd.xlane.f32.xlu2 %v952_v1  ;;  %v1057_v1 = vld [vmem:[#allocation14 + $0x28] sm:$0xff] }
 0x371   :  { %1077 = vmatpush.msra.mxu3 %v1057_v1 }
 0x372   :  { %v780_v3 = vpop.f32.mrf.mxu3 }
 0x373   :  { %v943_v4 = vmul.f32 %v780_v3, %v2949_v51  ;;  %v955_v10 = vmul.f32 %v780_v3, %v760_v63 }
 0x374   :  { %v833_v5 = vpop.f32.mrf.mxu0 }
 0x375   :  { %v834_v6 = vadd.f32 %v1922_v2, %v833_v5  ;;  %v944_v7 = vsel %vm939_vm7, %v943_v4, 0.0  ;;  %v956_v11 = vsel %vm939_vm7, %v955_v10, 0.0  ;;  %v1056_v4 = vld [vmem:[#allocation14 + $0x20] sm:$0xff] }
 0x376   :  { %945 = vadd.xlane.f32.xlu0 %v944_v7  ;;  %1078 = vmatpush.msra.mxu3 %v1056_v4  ;;  %v1016_v7 = vld [vmem:[#allocation14 + $0x18] sm:$0xff] }
 0x377   :  { %vm836_vm8 = vcmp.gt.f32.partialorder %v834_v6, 0.0  ;;  %v837_v8 = vmul.f32 0.25, %v834_v6  ;;  %1098 = vmatpush.msra.mxu2 %v1016_v7 }
 0x379   :  { %v838_v9 = vsel %vm836_vm8, %v834_v6, %v837_v8 }
 0x37a   :  { %1820 = vmatmul.msk.f32.vlgmr.msra.gmra.mxu1 %vm452_vm1, %v838_v9 }
 0x37e   :  { %957 = vadd.xlane.f32.xlu0 %v956_v11 }
 0x3e3   :  { %v954_v37 = vpop.xlane.xlu2 %953 }
 0x3e9   :  { %v946_v33 = vpop.xlane.xlu0 %945 }
 0x3f1   :  { %v958_v34 = vpop.xlane.xlu0 %957 }
 0x3f2   :  { %v1017_v35 = vmax.f32 %v946_v33, %v958_v34 }
 0x3f7   :  { %v869_v15 = vpop.f32.mrf.mxu1 }
 0x3f8   :  { %v870_v16 = vadd.f32 %v1923_v14, %v869_v15  ;;  %v1186_v14 = vld [vmem:[#allocation19 + $0x8] sm:$0xff]  ;;  %v1015_v15 = vld [vmem:[#allocation14 + $0x10] sm:$0xff] }
 0x3f9   :  { %1099 = vmatpush.msra.mxu2 %v1015_v15 }
 0x3fa   :  { %vm872_vm9 = vcmp.gt.f32.partialorder %v870_v16, 0.0  ;;  %v873_v17 = vmul.f32 0.25, %v870_v16 }
 0x3fc   :  { %v2978_v18 = vsel %vm872_vm9, %v870_v16, %v873_v17 }
 0x3fd   :  { %1822 = vmatmul.msk.f32.vlgmr.msrb.gmra.mxu3 %vm452_vm1, %v2978_v18  ;;  %1824 = vmatmul.msk.f32.vlgmr.msra.gmra.mxu0 %vm452_vm1, %v2978_v18 }
 0x3fe   :  { %1829 = vmatmul.msk.f32.vlgmr.msrb.gmra.mxu1 %vm452_vm1, %v2978_v18  ;;  %1208 = vmatpush.msrb.mxu3 %v1186_v14 }
 0x47a   :  { %v915_v19 = vpop.f32.mrf.mxu0 }
 0x47b   :  { %v947_v20 = vmul.f32 %v915_v19, %v2949_v51  ;;  %v959_v31 = vmul.f32 %v915_v19, %v760_v63 }
 0x47d   :  { %v948_v21 = vsel %vm939_vm7, %v947_v20, 0.0  ;;  %v960_v32 = vsel %vm939_vm7, %v959_v31, 0.0  ;;  %v1147_v31 = vld [vmem:[#allocation14 + $0x50] sm:$0xff] }
 0x47e   :  { %949 = vadd.xlane.f32.xlu0 %v948_v21 }
 0x480   :  { %v895_v22 = vpop.f32.mrf.mxu3 }
 0x481   :  { %v967_v23 = vmul.f32 %v895_v22, %v780_v3  ;;  %v963_v24 = vmul.f32 %v895_v22, %v633_v62  ;;  %v971_v28 = vmul.f32 %v915_v19, %v895_v22  ;;  %v1185_v22 = vld [vmem:[#allocation19] sm:$0xff] }
 0x482   :  { %1209 = vmatpush.msrb.mxu3 %v1185_v22 }
 0x483   :  { %v968_v25 = vsel %vm939_vm7, %v967_v23, 0.0  ;;  %v964_v26 = vsel %vm939_vm7, %v963_v24, 0.0  ;;  %v972_v30 = vsel %vm939_vm7, %v971_v28, 0.0  ;;  %v1014_v23 = vld [vmem:[#allocation14 + $0x8] sm:$0xff]  ;;  %v1013_v28 = vld [vmem:[#allocation14] sm:$0xff] }
 0x484   :  { %969 = vadd.xlane.f32.xlu1 %v968_v25  ;;  %965 = vadd.xlane.f32.xlu2 %v964_v26 }
 0x485   :  { %1100 = vmatpush.msra.mxu2 %v1014_v23 }
 0x487   :  { %1101 = vmatpush.msra.mxu2 %v1013_v28 }
 0x48c   :  { %941 = vadd.xlane.f32.xlu1 %v940_v29  ;;  %973 = vadd.xlane.f32.xlu2 %v972_v30  ;;  %v1148_v30 = vld [vmem:[#allocation14 + $0x58] sm:$0xff] }
 0x48d   :  { %1164 = vmatpush.msrb.mxu0 %v1148_v30 }
 0x48f   :  { %1165 = vmatpush.msrb.mxu0 %v1147_v31 }
 0x494   :  { %961 = vadd.xlane.f32.xlu1 %v960_v32 }
 0x4f1   :  { %v950_v62 = vpop.xlane.xlu0 %949 }
 0x4f7   :  { %v970_v36 = vpop.xlane.xlu1 %969  ;;  %v966_v47 = vpop.xlane.xlu2 %965 }
 0x4f8   :  { %v1018_v38 = vmax.f32 %v1017_v35, %v970_v36  ;;  %v1146_v35 = vld [vmem:[#allocation14 + $0x48] sm:$0xff] }
 0x4f9   :  { %1166 = vmatpush.msrb.mxu0 %v1146_v35 }
 0x4fa   :  { %v1019_v39 = vsub.f32 %v946_v33, %v1018_v38  ;;  %v1022_v40 = vsub.f32 %v958_v34, %v1018_v38  ;;  %v1025_v41 = vsub.f32 %v970_v36, %v1018_v38  ;;  %v1145_v38 = vld [vmem:[#allocation14 + $0x40] sm:$0xff] }
 0x4fb   :  { %1167 = vmatpush.msrb.mxu0 %v1145_v38 }
 0x4fc   :  { %v1020_v42 = vmul.f32 1.442695, %v1019_v39  ;;  %v1023_v44 = vmul.f32 1.442695, %v1022_v40  ;;  %v1026_v45 = vmul.f32 1.442695, %v1025_v41 }
 0x4fe   :  { %1932 = vpow2.f32 %v1020_v42 }
 0x4ff   :  { %1934 = vpow2.f32 %v1023_v44  ;;  %v942_v46 = vpop.xlane.xlu1 %941  ;;  %v974_v5 = vpop.xlane.xlu2 %973 }
 0x500   :  { %v975_v48 = vmax.f32 %v942_v46, %v954_v37  ;;  %1936 = vpow2.f32 %v1026_v45 }
 0x502   :  { %v976_v49 = vmax.f32 %v975_v48, %v966_v47 }
 0x504   :  { %v2994_v51 = vpop.eup %1932  ;;  %v977_v52 = vsub.f32 %v942_v46, %v976_v49  ;;  %v980_v53 = vsub.f32 %v954_v37, %v976_v49  ;;  %v983_v54 = vsub.f32 %v966_v47, %v976_v49 }
 0x505   :  { %v2996_v57 = vpop.eup %1934 }
 0x506   :  { %v1028_v58 = vadd.f32 %v2996_v57, %v2994_v51  ;;  %v978_v59 = vmul.f32 1.442695, %v977_v52  ;;  %v981_v60 = vmul.f32 1.442695, %v980_v53  ;;  %v3000_v61 = vpop.eup %1936  ;;  %v984_v63 = vmul.f32 1.442695, %v983_v54  ;;  %v800_v52 = vpop.f32.mrf.mxu2 }
 0x507   :  { %v962_v0 = vpop.xlane.xlu1 %961 }
 0x508   :  { %v1029_v2 = vadd.f32 %v3000_v61, %v1028_v58  ;;  %1938 = vpow2.f32 %v978_v59  ;;  %v1106_v3 = vmax.f32 %v950_v62, %v962_v0  ;;  %v935_v59 = vpop.f32.mrf.mxu1 }
 0x509   :  { %1940 = vpow2.f32 %v981_v60 }
 0x50a   :  { %1942 = vrcp.f32 %v1029_v2  ;;  %v1107_v6 = vmax.f32 %v1106_v3, %v974_v5  ;;  %v1041_v32 = vand.u32 2147483648, %v1029_v2  ;;  %v1039_v34 = vand.u32 2147483647, %v1029_v2 }
 0x50b   :  { %1944 = vpow2.f32 %v984_v63  ;;  %vm1035_vm11 = vweird.f32 %v1029_v2 }
 0x50c   :  { %v1108_v8 = vsub.f32 %v950_v62, %v1107_v6  ;;  %v1111_v9 = vsub.f32 %v962_v0, %v1107_v6  ;;  %v1114_v10 = vsub.f32 %v974_v5, %v1107_v6  ;;  %v1042_v40 = vor.u32 1.1754944e-38, %v1041_v32 }
 0x50d   :  { %vm1040_vm13 = vcmp.eq.f32.partialorder %v1039_v34, 8.507059e+37 }
 0x50e   :  { %v3003_v11 = vpop.eup %1938  ;;  %v1109_v17 = vmul.f32 1.442695, %v1108_v8  ;;  %v1112_v19 = vmul.f32 1.442695, %v1111_v9  ;;  %v1115_v26 = vmul.f32 1.442695, %v1114_v10 }
 0x50f   :  { %v3005_v16 = vpop.eup %1940 }
 0x510   :  { %v1943_v20 = vpop.eup %1942  ;;  %v986_v21 = vadd.f32 %v3005_v16, %v3003_v11  ;;  %1946 = vpow2.f32 %v1109_v17 }
 0x511   :  { %v3009_v24 = vpop.eup %1944  ;;  %v1031_v25 = vmul.f32 %v1943_v20, %v1029_v2  ;;  %1948 = vpow2.f32 %v1112_v19  ;;  %vm1036_vm10 = vweird.f32 %v1943_v20 }
 0x512   :  { %v987_v27 = vadd.f32 %v3009_v24, %v986_v21  ;;  %vm1037_vm12 = vmor %vm1035_vm11, %vm1036_vm10 }
 0x513   :  { %v1032_v29 = vsub.f32 1.0, %v1031_v25 }
 0x514   :  { %1950 = vrcp.f32 %v987_v27  ;;  %v997_v60 = vand.u32 2147483647, %v987_v27  ;;  %v999_v62 = vand.u32 2147483648, %v987_v27  ;;  %vm993_vm15 = vweird.f32 %v987_v27 }
 0x515   :  { %v1033_v33 = vmul.f32 %v1943_v20, %v1032_v29  ;;  %1952 = vpow2.f32 %v1115_v26 }
 0x516   :  { %v3012_v36 = vpop.eup %1946  ;;  %vm998_vm3 = vcmp.eq.f32.partialorder %v997_v60, 8.507059e+37  ;;  %v1371_v60 = vld [vmem:[#allocation22 + $0x30] sm:$0xff] }
 0x517   :  { %v1034_v37 = vadd.f32 %v1943_v20, %v1033_v33  ;;  %v3014_v39 = vpop.eup %1948 }
 0x518   :  { %v1117_v42 = vadd.f32 %v3014_v39, %v3012_v36 }
 0x519   :  { %v1038_v41 = vsel %vm1037_vm12, %v1943_v20, %v1034_v37 }
 0x51a   :  { %v1951_v44 = vpop.eup %1950  ;;  %v1043_v45 = vsel %vm1040_vm13, %v1042_v40, %v1038_v41  ;;  %v1217_v41 = vld [vmem:[#allocation22] sm:$0xff] }
 0x51b   :  { %v1953_v46 = vpop.eup %1952  ;;  %v1045_v47 = vmul.f32 %v2994_v51, %v1043_v45  ;;  %v1047_v48 = vmul.f32 %v2996_v57, %v1043_v45  ;;  %v1050_v49 = vmul.f32 %v3000_v61, %v1043_v45  ;;  %v989_v50 = vmul.f32 %v1951_v44, %v987_v27  ;;  %v1178_v45 = vld [vmem:[%s3117_s10] sm:$0xf] }
 0x51c   :  { %v1118_v53 = vadd.f32 %v1953_v46, %v1117_v42  ;;  %vm994_vm14 = vweird.f32 %v1951_v44  ;;  %v1000_v57 = vor.u32 1.1754944e-38, %v999_v62  ;;  %v1335_v42 = vld [vmem:[#allocation19 + $0x10] sm:$0xff]  ;;  %1835 = vmatpush.xpose.msk.msra.mxu0 %vm452_vm1, %v1178_v45 }
 0x51d   :  { %v1046_v54 = vmul.f32 %v1045_v47, %v2976_v13  ;;  %v1048_v55 = vmul.f32 %v1047_v48, %v800_v52  ;;  %v990_v58 = vsub.f32 1.0, %v989_v50  ;;  %v1051_v0 = vmul.f32 %v1050_v49, %v935_v59  ;;  %vm995_vm2 = vmor %vm993_vm15, %vm994_vm14  ;;  %v1924_v48 = vld [vmem:[#allocation20] ss:$0 sm:$0xff]  ;;  %v1370_v62 = vld [vmem:[#allocation22 + $0x28] sm:$0xff] }
 0x51e   :  { %1954 = vrcp.f32 %v1118_v53  ;;  %v1128_v19 = vand.u32 2147483647, %v1118_v53  ;;  %v1130_v20 = vand.u32 2147483648, %v1118_v53  ;;  %vm1124_vm5 = vweird.f32 %v1118_v53 }
 0x51f   :  { %v1049_v63 = vadd.f32 %v1048_v55, %v1046_v54  ;;  %v991_v1 = vmul.f32 %v1951_v44, %v990_v58  ;;  %v1333_v54 = vld [vmem:[#allocation17 + $0x8] sm:$0xff]  ;;  %v1179_v55 = vld [vmem:[#allocation25] sm:$0xf]  ;;  %v1180_v58 = vld [vmem:[#allocation26] sm:$0xff] }
 0x520   :  { %vm1129_vm8 = vcmp.eq.f32.partialorder %v1128_v19, 8.507059e+37  ;;  %1837 = vmatpush.xpose.msk.msra.mxu1 %vm452_vm1, %v1179_v55 }
 0x521   :  { %v1052_v51 = vadd.f32 %v1051_v0, %v1049_v63  ;;  %v992_v2 = vadd.f32 %v1951_v44, %v991_v1  ;;  %v1369_v63 = vld [vmem:[#allocation22 + $0x20] sm:$0xff] }
 0x522   :  { %v1926_v1 = vld [vmem:[#allocation23] ss:$0 sm:$0xff] }
 0x523   :  { %v996_v61 = vsel %vm995_vm2, %v1951_v44, %v992_v2  ;;  %v1053_v3 = vmul.f32 0.5, %v1052_v51  ;;  %v1183_v44 = vld [vmem:[#allocation26 + $0x18] sm:$0xff] }
 0x524   :  { %v1955_v4 = vpop.eup %1954  ;;  %v1001_v5 = vsel %vm998_vm3, %v1000_v57, %v996_v61  ;;  %1846 = vmatpush.xpose.msk.msrb.mxu1 %vm452_vm1, %v1178_v45 }
 0x525   :  { %v1003_v6 = vmul.f32 %v3003_v11, %v1001_v5  ;;  %v1005_v7 = vmul.f32 %v3005_v16, %v1001_v5  ;;  %v1008_v8 = vmul.f32 %v3009_v24, %v1001_v5  ;;  %v1120_v9 = vmul.f32 %v1955_v4, %v1118_v53 }
 0x526   :  { %v1054_v10 = vadd.f32 %v1053_v3, %v2951_v56  ;;  %vm1125_vm4 = vweird.f32 %v1955_v4  ;;  %v1131_v24 = vor.u32 1.1754944e-38, %v1130_v20  ;;  %v1184_v56 = vld [vmem:[#allocation17] sm:$0xff]  ;;  %v1927_v3 = vld [vmem:[#allocation20 + $0x1] ss:$0 sm:$0xff] }
 0x527   :  { %v1004_v14 = vmul.f32 %v1003_v6, %v2976_v13  ;;  %v1006_v15 = vmul.f32 %v1005_v7, %v800_v52  ;;  %v1121_v17 = vsub.f32 1.0, %v1120_v9  ;;  %v1009_v22 = vmul.f32 %v1008_v8, %v935_v59  ;;  %vm1126_vm6 = vmor %vm1124_vm5, %vm1125_vm4  ;;  %v1617_v8 = vld [vmem:[#allocation32 + $0x38] sm:$0xff]  ;;  %v1616_v9 = vld [vmem:[#allocation32 + $0x30] sm:$0xff] }
 0x528   :  { %1830 = vmatmul.msk.f32.vlgmr.msra.gmra.mxu3 %vm452_vm1, %v1054_v10  ;;  %v1615_v10 = vld [vmem:[#allocation32 + $0x28] sm:$0xff] }
 0x529   :  { %v1007_v21 = vadd.f32 %v1006_v15, %v1004_v14  ;;  %v1122_v23 = vmul.f32 %v1955_v4, %v1121_v17  ;;  %1839 = vmatpush.xpose.msk.msra.mxu3 %vm452_vm1, %v1183_v44  ;;  %v1614_v14 = vld [vmem:[#allocation32 + $0x20] sm:$0xff] }
 0x52b   :  { %v1123_v11 = vadd.f32 %v1955_v4, %v1122_v23  ;;  %v1010_v16 = vadd.f32 %v1009_v22, %v1007_v21  ;;  %v1928_v23 = vld [vmem:[#allocation23 + $0x1] ss:$0 sm:$0xff] }
 0x52d   :  { %v1127_v25 = vsel %vm1126_vm6, %v1955_v4, %v1123_v11  ;;  %v1011_v26 = vmul.f32 0.5, %v1010_v16 }
 0x52e   :  { %v1132_v27 = vsel %vm1129_vm8, %v1131_v24, %v1127_v25  ;;  %v1925_v24 = vld [vmem:[#allocation16] ss:$0 sm:$0xff] }
 0x52f   :  { %v1134_v28 = vmul.f32 %v3012_v36, %v1132_v27  ;;  %v1136_v29 = vmul.f32 %v3014_v39, %v1132_v27  ;;  %v1139_v30 = vmul.f32 %v1953_v46, %v1132_v27  ;;  %v1012_v31 = vadd.f32 %v1011_v26, %v2932_v43  ;;  %v1220_v36 = vld [vmem:[#allocation22 + $0x18] sm:$0xff]  ;;  %v1219_v39 = vld [vmem:[#allocation22 + $0x10] sm:$0xff]  ;;  %v1218_v43 = vld [vmem:[#allocation22 + $0x8] sm:$0xff] }
 0x530   :  { %1833 = vmatmul.msk.f32.vlgmr.msrb.gmra.mxu3 %vm526_vm0, %v1184_v56  ;;  %1240 = vmatpush.msrb.mxu2 %v1220_v36  ;;  %v1181_v46 = vld [vmem:[#allocation26 + $0x8] sm:$0xff] }
 0x531   :  { %v1135_v32 = vmul.f32 %v1134_v28, %v2976_v13  ;;  %v1137_v33 = vmul.f32 %v1136_v29, %v800_v52  ;;  %1831 = vmatmul.msk.f32.vlgmr.msra.gmra.mxu2 %vm452_vm1, %v1012_v31  ;;  %v1140_v35 = vmul.f32 %v1139_v30, %v935_v59  ;;  %v1336_v13 = vld [vmem:[#allocation19 + $0x18] sm:$0xff] }
 0x532   :  { %1241 = vmatpush.msrb.mxu2 %v1219_v39  ;;  %v1372_v59 = vld [vmem:[#allocation22 + $0x38] sm:$0xff] }
 0x533   :  { %v1138_v34 = vadd.f32 %v1137_v33, %v1135_v32 }
 0x534   :  { %1242 = vmatpush.msrb.mxu2 %v1218_v43 }
 0x535   :  { %v1141_v37 = vadd.f32 %v1140_v35, %v1138_v34 }
 0x536   :  { %1243 = vmatpush.msrb.mxu2 %v1217_v41 }
 0x537   :  { %v1142_v38 = vmul.f32 0.5, %v1141_v37 }
 0x538   :  { %1359 = vmatpush.msra.mxu2 %v1336_v13 }
 0x539   :  { %v1143_v40 = vadd.f32 %v1142_v38, %v2978_v18  ;;  %v1182_v18 = vld [vmem:[#allocation26 + $0x10] sm:$0xff] }
 0x53a   :  { %1360 = vmatpush.msra.mxu2 %v1335_v42  ;;  %1840 = vmatpush.xpose.msk.msra.mxu3 %vm452_vm1, %v1182_v18 }
 0x53b   :  { %1832 = vmatmul.msk.f32.vlgmr.msrb.gmra.mxu0 %vm452_vm1, %v1143_v40 }
 0x53c   :  { %1393 = vmatpush.msrb.mxu0 %v1372_v59  ;;  %v1550_v59 = vld [vmem:[#allocation28 + $0x30] sm:$0xff] }
 0x53e   :  { %1841 = vmatpush.xpose.msk.msra.mxu3 %vm452_vm1, %v1181_v46  ;;  %1394 = vmatpush.msrb.mxu0 %v1371_v60 }
 0x540   :  { %1395 = vmatpush.msrb.mxu0 %v1370_v62  ;;  %v1549_v62 = vld [vmem:[#allocation28 + $0x28] sm:$0xff] }
 0x542   :  { %1842 = vmatpush.xpose.msk.msra.mxu3 %vm452_vm1, %v1180_v58  ;;  %1396 = vmatpush.msrb.mxu0 %v1369_v63 }
 0x5ab   :  { %v1080_v47 = vpop.f32.mrf.mxu3 }
 0x5b3   :  { %v1211_v49 = vpop.f32.mrf.mxu3 }
 0x5b4   :  { %v1212_v50 = vadd.f32 %v1924_v48, %v1211_v49  ;;  %v1103_v0 = vpop.f32.mrf.mxu2 }
 0x5b5   :  { %v1104_v22 = vadd.f32 %v1103_v0, %v1080_v47  ;;  %v1515_v47 = vld [vmem:[#allocation28 + $0x10] sm:$0xff]  ;;  %v1548_v0 = vld [vmem:[#allocation28 + $0x20] sm:$0xff] }
 0x5b6   :  { %vm1214_vm9 = vcmp.gt.f32.partialorder %v1212_v50, 0.0  ;;  %v1215_v52 = vmul.f32 0.25, %v1212_v50 }
 0x5b8   :  { %v1216_v53 = vsel %vm1214_vm9, %v1212_v50, %v1215_v52  ;;  %v1169_v15 = vpop.f32.mrf.mxu0  ;;  %v1514_v50 = vld [vmem:[#allocation28 + $0x8] sm:$0xff] }
 0x5b9   :  { %1834 = vmatmul.msk.f32.vlgmr.msrb.gmra.mxu2 %vm452_vm1, %v1216_v53  ;;  %v1172_v16 = vadd.f32 %v1169_v15, %v1104_v22 }
 0x5ba   :  { %1848 = vmatpush.xpose.msk.msrb.mxu2 %vm452_vm1, %v1179_v55  ;;  %v1513_v55 = vld [vmem:[#allocation28] sm:$0xff] }
 0x5bb   :  { %v1177_v26 = vadd.f32 %v1925_v24, %v1172_v16 }
 0x5bd   :  { %v1611_v28 = vmul.f32 0.25, %v1177_v26  ;;  %vm1610_vm12 = vcmp.gt.f32.partialorder %v1177_v26, 0.0 }
 0x5bf   :  { %v1612_v29 = vsel %vm1610_vm12, %v1177_v26, %v1611_v28 }
 0x5c1   :  { %1844 = vmatmul.msk.f32.vlgmr.msra.gmra.mxu2 %vm526_vm0, %v1333_v54  ;;  %v1551_v54 = vld [vmem:[#allocation28 + $0x38] sm:$0xff] }
 0x5c2   :  { %1633 = vmatpush.msra.mxu2 %v1617_v8 }
 0x5c4   :  { %1634 = vmatpush.msra.mxu2 %v1616_v9 }
 0x5c6   :  { %1635 = vmatpush.msra.mxu2 %v1615_v10 }
 0x5c8   :  { %1636 = vmatpush.msra.mxu2 %v1614_v14 }
 0x63c   :  { %v1245_v51 = vpop.f32.mrf.mxu2 }
 0x63d   :  { %v1246_v2 = vadd.f32 %v1926_v1, %v1245_v51  ;;  %v1609_v1 = vld [vmem:[#allocation32 + $0x18] sm:$0xff]  ;;  %v1608_v51 = vld [vmem:[#allocation32 + $0x10] sm:$0xff] }
 0x63f   :  { %vm1248_vm0 = vcmp.gt.f32.partialorder %v1246_v2, 0.0  ;;  %v1249_v57 = vmul.f32 0.25, %v1246_v2 }
 0x641   :  { %v3047_v61 = vsel %vm1248_vm0, %v1246_v2, %v1249_v57 }
 0x642   :  { %1836 = vmatmul.msk.f32.vlgmr.msra.gmra.mxu0 %vm452_vm1, %v3047_v61  ;;  %1838 = vmatmul.msk.f32.vlgmr.msra.gmra.mxu1 %vm452_vm1, %v3047_v61 }
 0x643   :  { %1843 = vmatmul.msk.f32.vlgmr.msra.gmra.mxu3 %vm452_vm1, %v3047_v61  ;;  %1850 = vmatpush.xpose.msk.msra.mxu0 %vm452_vm1, %v1183_v44  ;;  %v1516_v44 = vld [vmem:[#allocation28 + $0x18] sm:$0xff] }
 0x644   :  { %v1362_v4 = vpop.f32.mrf.mxu2  ;;  %1590 = vmatpush.msrb.mxu3 %v1516_v44  ;;  %1567 = vmatpush.msra.mxu1 %v1551_v54 }
 0x645   :  { %v1363_v5 = vadd.f32 %v1927_v3, %v1362_v4  ;;  %v1607_v3 = vld [vmem:[#allocation32 + $0x8] sm:$0xff] }
 0x646   :  { %1591 = vmatpush.msrb.mxu3 %v1515_v47  ;;  %1568 = vmatpush.msra.mxu1 %v1550_v59 }
 0x647   :  { %vm1365_vm10 = vcmp.gt.f32.partialorder %v1363_v5, 0.0  ;;  %v1366_v6 = vmul.f32 0.25, %v1363_v5  ;;  %1851 = vmatpush.xpose.msk.msra.mxu0 %vm452_vm1, %v1182_v18 }
 0x648   :  { %1592 = vmatpush.msrb.mxu3 %v1514_v50  ;;  %1569 = vmatpush.msra.mxu1 %v1549_v62  ;;  %v1668_v50 = vld [vmem:[#allocation32 + $0x40] sm:$0xff]  ;;  %v1706_v62 = vld [vmem:[#allocation34 + $0x10] sm:$0xff] }
 0x649   :  { %v1367_v7 = vsel %vm1365_vm10, %v1363_v5, %v1366_v6  ;;  %v1606_v5 = vld [vmem:[#allocation32] sm:$0xff] }
 0x64a   :  { %1845 = vmatmul.msk.f32.vlgmr.msrb.gmra.mxu0 %vm452_vm1, %v1367_v7  ;;  %1593 = vmatpush.msrb.mxu3 %v1513_v55 }
 0x64b   :  { %1852 = vmatpush.xpose.msk.msra.mxu0 %vm452_vm1, %v1181_v46  ;;  %1570 = vmatpush.msra.mxu1 %v1548_v0  ;;  %v1704_v0 = vld [vmem:[#allocation34] sm:$0xff] }
 0x64f   :  { %1853 = vmatpush.xpose.msk.msra.mxu0 %vm452_vm1, %v1180_v58 }
 0x6bf   :  { %v1274_v17 = vpop.f32.mrf.mxu0  ;;  %v1297_v19 = vpop.f32.mrf.mxu1 }
 0x6c0   :  { %v1467_v20 = vmul.f32 %v1297_v19, %v1274_v17 }
 0x6c2   :  { %v1468_v21 = vsel %vm939_vm7, %v1467_v20, 0.0 }
 0x6c3   :  { %1469 = vadd.xlane.f32.xlu0 %v1468_v21 }
 0x6c6   :  { %v1329_v26 = vpop.f32.mrf.mxu3 }
 0x6c7   :  { %v1398_v11 = vpop.f32.mrf.mxu0 }
 0x6c8   :  { %v1399_v25 = vadd.f32 %v1928_v23, %v1398_v11 }
 0x6ca   :  { %vm1401_vm11 = vcmp.gt.f32.partialorder %v1399_v25, 0.0  ;;  %v1402_v56 = vmul.f32 0.25, %v1399_v25 }
 0x6cc   :  { %v3061_v27 = vsel %vm1401_vm11, %v1399_v25, %v1402_v56 }
 0x6cd   :  { %1847 = vmatmul.msk.f32.vlgmr.msrb.gmra.mxu1 %vm452_vm1, %v3061_v27  ;;  %1849 = vmatmul.msk.f32.vlgmr.msrb.gmra.mxu2 %vm452_vm1, %v3061_v27 }
 0x6ce   :  { %1854 = vmatmul.msk.f32.vlgmr.msra.gmra.mxu0 %vm452_vm1, %v3061_v27  ;;  %1656 = vmatpush.msrb.mxu1 %v1609_v1 }
 0x6d0   :  { %1657 = vmatpush.msrb.mxu1 %v1608_v51 }
 0x6d2   :  { %1658 = vmatpush.msrb.mxu1 %v1607_v3 }
 0x6d4   :  { %1659 = vmatpush.msrb.mxu1 %v1606_v5 }
 0x6d5   :  { %1857 = vmatmul.msk.f32.vlgmr.msra.gmra.mxu2 %vm452_vm1, %v1612_v29 }
 0x736   :  { %v1470_v40 = vpop.xlane.xlu0 %1469 }
 0x74a   :  { %v1424_v30 = vpop.f32.mrf.mxu1 }
 0x74b   :  { %v1475_v31 = vmul.f32 %v1424_v30, %v1297_v19  ;;  %v1464_v28 = vpop.f32.mrf.mxu0 }
 0x74d   :  { %v1476_v32 = vsel %vm939_vm7, %v1475_v31, 0.0 }
 0x74e   :  { %1477 = vadd.xlane.f32.xlu1 %v1476_v32 }
 0x750   :  { %v1444_v33 = vpop.f32.mrf.mxu2 }
 0x751   :  { %v1471_v34 = vmul.f32 %v1444_v33, %v1274_v17  ;;  %v1479_v35 = vmul.f32 %v1444_v33, %v1424_v30  ;;  %v1920_v33 = vld [vmem:[%s3118_s8] ss:$0 sm:$0xff] }
 0x753   :  { %v1472_v37 = vsel %vm939_vm7, %v1471_v34, 0.0  ;;  %v1480_v38 = vsel %vm939_vm7, %v1479_v35, 0.0 }
 0x754   :  { %1473 = vadd.xlane.f32.xlu2 %v1472_v37  ;;  %1481 = vadd.xlane.f32.xlu0 %v1480_v38 }
 0x758   :  { %v1638_v51 = vpop.f32.mrf.mxu2 }
 0x7c1   :  { %v1478_v36 = vpop.xlane.xlu1 %1477 }
 0x7c2   :  { %v1483_v39 = vmax.f32 %v1470_v40, %v1478_v36 }
 0x7c4   :  { %v1484_v43 = vsub.f32 %v1470_v40, %v1483_v39  ;;  %v1487_v41 = vsub.f32 %v1478_v36, %v1483_v39  ;;  %v508_v39 = vadd.f32 %v1920_v33, %v2974_v12  ;;  %v1671_v12 = vld [vmem:[#allocation32 + $0x58] sm:$0xff] }
 0x7c5   :  { %1687 = vmatpush.msra.mxu3 %v1671_v12 }
 0x7c6   :  { %v1485_v13 = vmul.f32 1.442695, %v1484_v43  ;;  %v1488_v42 = vmul.f32 1.442695, %v1487_v41  ;;  %v511_v44 = vmul.f32 0.25, %v508_v39  ;;  %vm510_vm6 = vcmp.gt.f32.partialorder %v508_v39, 0.0 }
 0x7c7   :  { %v1474_v45 = vpop.xlane.xlu2 %1473  ;;  %v1482_v18 = vpop.xlane.xlu0 %1481 }
 0x7c8   :  { %1956 = vpow2.f32 %v1485_v13  ;;  %v1517_v46 = vmax.f32 %v1474_v45, %v1482_v18 }
 0x7c9   :  { %1958 = vpow2.f32 %v1488_v42 }
 0x7ca   :  { %v1518_v48 = vsub.f32 %v1474_v45, %v1517_v46  ;;  %v1521_v49 = vsub.f32 %v1482_v18, %v1517_v46  ;;  %v512_v46 = vsel %vm510_vm6, %v508_v39, %v511_v44 }
 0x7cb   :  { %v1604_v47 = vmul.f32 0.25, %v512_v46  ;;  %vm1603_vm8 = vcmp.gt.f32.partialorder %v512_v46, 0.0 }
 0x7cc   :  { %v1519_v52 = vmul.f32 1.442695, %v1518_v48  ;;  %v1522_v53 = vmul.f32 1.442695, %v1521_v49  ;;  %v1669_v49 = vld [vmem:[#allocation32 + $0x48] sm:$0xff] }
 0x7cd   :  { %v1605_v48 = vsel %vm1603_vm8, %v512_v46, %v1604_v47 }
 0x7ce   :  { %v1957_v58 = vpop.eup %1956  ;;  %1960 = vpow2.f32 %v1519_v52  ;;  %v1929_v52 = vld [vmem:[%s3119_s21] ss:$0 sm:$0xff] }
 0x7cf   :  { %v1959_v60 = vpop.eup %1958  ;;  %1962 = vpow2.f32 %v1522_v53 }
 0x7d0   :  { %v1490_v63 = vadd.f32 %v1959_v60, %v1957_v58 }
 0x7d2   :  { %1964 = vrcp.f32 %v1490_v63  ;;  %v1502_v9 = vand.u32 2147483648, %v1490_v63  ;;  %v1500_v14 = vand.u32 2147483647, %v1490_v63  ;;  %vm1496_vm13 = vweird.f32 %v1490_v63 }
 0x7d4   :  { %v1961_v2 = vpop.eup %1960  ;;  %v1503_v20 = vor.u32 1.1754944e-38, %v1502_v9  ;;  %vm1501_vm15 = vcmp.eq.f32.partialorder %v1500_v14, 8.507059e+37 }
 0x7d5   :  { %v1963_v57 = vpop.eup %1962 }
 0x7d6   :  { %v1524_v4 = vadd.f32 %v1963_v57, %v1961_v2 }
 0x7d8   :  { %v1965_v6 = vpop.eup %1964  ;;  %1966 = vrcp.f32 %v1524_v4  ;;  %v1534_v11 = vand.u32 2147483647, %v1524_v4  ;;  %v1536_v16 = vand.u32 2147483648, %v1524_v4  ;;  %vm1530_vm3 = vweird.f32 %v1524_v4 }
 0x7d9   :  { %v1492_v7 = vmul.f32 %v1965_v6, %v1490_v63  ;;  %vm1497_vm7 = vweird.f32 %v1965_v6  ;;  %v1705_v63 = vld [vmem:[#allocation34 + $0x8] sm:$0xff] }
 0x7da   :  { %vm1498_vm14 = vmor %vm1496_vm13, %vm1497_vm7  ;;  %v1537_v32 = vor.u32 1.1754944e-38, %v1536_v16  ;;  %vm1535_vm5 = vcmp.eq.f32.partialorder %v1534_v11, 8.507059e+37 }
 0x7db   :  { %v1493_v8 = vsub.f32 1.0, %v1492_v7 }
 0x7dd   :  { %v1494_v10 = vmul.f32 %v1965_v6, %v1493_v8  ;;  %v1931_v8 = vld [vmem:[%s2723_s27] ss:$0 sm:$0xff] }
 0x7de   :  { %v1967_v15 = vpop.eup %1966 }
 0x7df   :  { %v1495_v17 = vadd.f32 %v1965_v6, %v1494_v10  ;;  %v1526_v19 = vmul.f32 %v1967_v15, %v1524_v4  ;;  %vm1531_vm2 = vweird.f32 %v1967_v15 }
 0x7e0   :  { %vm1532_vm4 = vmor %vm1530_vm3, %vm1531_vm2 }
 0x7e1   :  { %v1499_v21 = vsel %vm1498_vm14, %v1965_v6, %v1495_v17  ;;  %v1527_v22 = vsub.f32 1.0, %v1526_v19 }
 0x7e2   :  { %v1504_v23 = vsel %vm1501_vm15, %v1503_v20, %v1499_v21 }
 0x7e3   :  { %v1506_v24 = vmul.f32 %v1957_v58, %v1504_v23  ;;  %v1508_v25 = vmul.f32 %v1959_v60, %v1504_v23  ;;  %v1528_v56 = vmul.f32 %v1967_v15, %v1527_v22  ;;  %v1707_v60 = vld [vmem:[#allocation34 + $0x18] sm:$0xff] }
 0x7e4   :  { %1727 = vmatpush.msrb.mxu2 %v1707_v60 }
 0x7e5   :  { %v1507_v29 = vmul.f32 %v1506_v24, %v1329_v26  ;;  %v1509_v30 = vmul.f32 %v1508_v25, %v1464_v28  ;;  %v1529_v31 = vadd.f32 %v1967_v15, %v1528_v56 }
 0x7e6   :  { %1728 = vmatpush.msrb.mxu2 %v1706_v62 }
 0x7e7   :  { %v1510_v34 = vadd.f32 %v1509_v30, %v1507_v29  ;;  %v1533_v35 = vsel %vm1532_vm4, %v1967_v15, %v1529_v31 }
 0x7e8   :  { %v1538_v37 = vsel %vm1535_vm5, %v1537_v32, %v1533_v35  ;;  %1729 = vmatpush.msrb.mxu2 %v1705_v63 }
 0x7e9   :  { %v1511_v38 = vmul.f32 0.5, %v1510_v34  ;;  %v1540_v40 = vmul.f32 %v1961_v2, %v1538_v37  ;;  %v1542_v36 = vmul.f32 %v1963_v57, %v1538_v37  ;;  %v1930_v57 = vld [vmem:[%s2713_s25] ss:$0 sm:$0xff]  ;;  %s2484_s25 = sshra.s32 %s1747_s28, 4  ;;  %s2485_s25 = int_to_ptr.hbm [resolvable:$true] %s2484_s25 }
 0x7ea   :  { %1730 = vmatpush.msrb.mxu2 %v1704_v0  ;;  %s2486_s24 = scalar_lea.hbm %s2485_s25, 8  ;;  %p2489_p8 = scmp.lt.s32.totalorder %s2485_s25, %s2728_s14 }
 0x7eb   :  { %v1541_v43 = vmul.f32 %v1540_v40, %v1329_v26  ;;  %v1543_v41 = vmul.f32 %v1542_v36, %v1464_v28  ;;  %v1512_v13 = vadd.f32 %v1511_v38, %v3047_v61  ;;  %v1670_v61 = vld [vmem:[#allocation32 + $0x50] sm:$0xff]  ;;  %p2487_p7 = scmp.ne.s32.totalorder %s2485_s25, %s2486_s24  ;;  %p2490_p9 = scmp.lt.s32.totalorder %s2488_s12, %s2486_s24 }
 0x7ec   :  { %1688 = vmatpush.msra.mxu3 %v1670_v61 }
 0x7ed   :  { %v1544_v42 = vadd.f32 %v1543_v41, %v1541_v43  ;;  %1856 = vmatmul.msk.f32.vlgmr.msrb.gmra.mxu3 %vm452_vm1, %v1512_v13  ;;  %p2491_p10 = por %p2490_p9, %p2489_p8 }
 0x7ee   :  { %1689 = vmatpush.msra.mxu3 %v1669_v49 }
 0x7ef   :  { %v1545_v45 = vmul.f32 0.5, %v1544_v42  ;;  %p2492_p11 = pnand %p2491_p10, %p2487_p7 }
 0x7f0   :  { %1690 = vmatpush.msra.mxu3 %v1668_v50 }
 0x7f1   :  { %v1546_v18 = vadd.f32 %v1545_v45, %v3061_v27 }
 0x7f3   :  { %1855 = vmatmul.msk.f32.vlgmr.msra.gmra.mxu1 %vm452_vm1, %v1546_v18 }
 0x7fb   :  { %1858 = vmatmul.msk.f32.vlgmr.msrb.gmra.mxu1 %vm452_vm1, %v1605_v48 }
 0x870   :  { %v1572_v53 = vpop.f32.mrf.mxu1  ;;  %v1595_v54 = vpop.f32.mrf.mxu3 }
 0x871   :  { %v1596_v27 = vadd.f32 %v1595_v54, %v1572_v53 }
 0x873   :  { %v1602_v55 = vadd.f32 %v1929_v52, %v1596_v27 }
 0x875   :  { %vm1664_vm9 = vcmp.gt.f32.partialorder %v1602_v55, 0.0  ;;  %v1665_v58 = vmul.f32 0.25, %v1602_v55 }
 0x877   :  { %v1666_v59 = vsel %vm1664_vm9, %v1602_v55, %v1665_v58 }
 0x878   :  { %1859 = vmatmul.msk.f32.vlgmr.msra.gmra.mxu3 %vm452_vm1, %v1666_v59  ;;  %v1661_v1 = vpop.f32.mrf.mxu1 }
 0x879   :  { %v1662_v2 = vadd.f32 %v1661_v1, %v1638_v51 }
 0x8fb   :  { %v1692_v3 = vpop.f32.mrf.mxu3 }
 0x8fc   :  { %v1695_v4 = vadd.f32 %v1692_v3, %v1662_v2 }
 0x8fe   :  { %v1700_v5 = vadd.f32 %v1930_v57, %v1695_v4 }
 0x900   :  { %vm1701_vm0 = vcmp.gt.f32.partialorder %v1700_v5, 0.0  ;;  %v1702_v6 = vmul.f32 0.25, %v1700_v5 }
 0x902   :  { %v1703_v7 = vsel %vm1701_vm0, %v1700_v5, %v1702_v6 }
 0x903   :  { %1860 = vmatmul.msk.f32.vlgmr.msrb.gmra.mxu2 %vm452_vm1, %v1703_v7 }
 0x986   :  { %v1732_v9 = vpop.f32.mrf.mxu2 }
 0x987   :  { %v1733_v10 = vadd.f32 %v1931_v8, %v1732_v9 }
 0x989   :  { %vm1735_vm10 = vcmp.gt.f32.partialorder %v1733_v10, 0.0  ;;  %v1736_v14 = vmul.f32 0.25, %v1733_v10 }
 0x98b   :  { %v1737_v15 = vsel %vm1735_vm10, %v1733_v10, %v1736_v14 }
 0x98c   :  { %1738 = vst.msk [vmem:[#allocation35] sm:$0xff] %vm452_vm1, %v1737_v15 }
 0x98d   :  { %2495 = shalt.err (!%p2492_p11)
}
 0x98e   :  { %1749 = dma.vmem_to_hbm [thread:$0]  %s1745_s9, 128, %s1747_s28, [#allocation4]  }
 0x98f   :  { %2518 = dma.done.wait [#allocation4], 128  }
 0x990   :  { %2519 = vsyncadd [#allocation4], 4294967168 }
 0x991   :  { %1754 = vsyncpa [#allocation3], 1 }
 0x992   :  { %1755 = vsyncpa [#allocation6], 1 }
 0x993   :  { %1756 = vsyncpa [#allocation9], 1 }
 0x994   :  { %1757 = vsyncpa [#allocation12], 1 }
 0x995   :  { %1758 = vsyncpa [#allocation15], 1 }
 0x996   :  { %1759 = vsyncpa [#allocation18], 1 }
 0x997   :  { %1760 = vsyncpa [#allocation21], 1 }
 0x998   :  { %1761 = vsyncpa [#allocation24], 1 }
 0x999   :  { %1762 = vsyncpa [#allocation27], 1 }
 0x99a   :  { %1763 = vsyncpa [#allocation30], 1 }
 0x99b   :  { %1764 = vsyncpa [#allocation33], 1 }
 0x99c   :  { %1765 = vsyncpa [#allocation4], 1 }

</bundles_post_ra>
